<compile_context>
chip_gen: v7x
topology: tpu7x:2x2x1
jax: 0.10.0
libtpu: 0.0.40
codegen_flags: <defaults>
</compile_context>

<pallas_src>
import functools

import jax
import jax.numpy as jnp
from jax import lax
from jax.experimental import pallas as pl
from jax.experimental.pallas import tpu as pltpu

IN_DIM = 24
HIDDEN = 256
CHUNK = 64                      # fc2 rows fused per step (4 chunks of 64)
N_CHUNKS = HIDDEN // CHUNK
TM_MAX = 2048                   # max batch tile (review: 1024-4096 sweet spot)


def mlp_kernel(x_ref, w1_ref, w2_ref, c_ref, b3_ref, o_ref):
    # x_ref : (TM, 24)   f32  streamed batch tile (natural layout)
    # w1_ref: (256, 24)  bf16 VMEM-resident
    # w2_ref: (256, 256) bf16 VMEM-resident
    # c_ref : (256, 3)   f32  VMEM-resident packed [b1 | b2 | w3]
    # b3_ref: (1, 1)     f32  SMEM scalar
    # o_ref : (1, TM)    f32  lane-dense output row (batch on lanes)
    tm = o_ref.shape[-1]
    xb = x_ref[...].astype(jnp.bfloat16)                       # (TM, 24)

    # fc1: h1[h, b] = sum_k W1[h, k] * x[b, k]   (A @ B^T, no transpose pass),
    # f32 accumulation on the MXU; bias + ReLU in f32 (v5e-safe) with the bf16
    # cast fused into the same expression.
    h1 = lax.dot_general(
        w1_ref[...], xb,
        dimension_numbers=(((1,), (1,)), ((), ())),
        preferred_element_type=jnp.float32)                    # (256, TM) f32
    b1 = c_ref[:, 0:1]                                         # (256, 1)
    h1 = jnp.maximum(h1 + b1, 0.0).astype(jnp.bfloat16)        # (256, TM) bf16

    # fc2 + out fused: loop over HIDDEN output rows in chunks so the full
    # (256, TM) h2 is never materialized in VMEM.  Each chunk: MXU matmul,
    # bias + ReLU, multiply by its w3 slice, sublane-reduce into (1, TM).
    acc = jnp.zeros((1, tm), jnp.float32)
    for c in range(N_CHUNKS):
        r0 = c * CHUNK
        w2c = w2_ref[r0:r0 + CHUNK, :]                         # (64, 256) bf16
        b2c = c_ref[r0:r0 + CHUNK, 1:2]                        # (64, 1)   f32
        w3c = c_ref[r0:r0 + CHUNK, 2:3]                        # (64, 1)   f32
        h2c = jnp.dot(w2c, h1, preferred_element_type=jnp.float32)  # (64, TM)
        h2c = jnp.maximum(h2c + b2c, 0.0)
        acc = acc + jnp.sum(h2c * w3c, axis=0, keepdims=True)

    o_ref[...] = (acc + b3_ref[0, 0]).astype(o_ref.dtype)


@functools.partial(jax.jit, static_argnames=("tm",))
def _mlp_forward(x, w1b, w2b, consts, b3, *, tm):
    B = x.shape[0]
    n_tiles = pl.cdiv(B, tm)
    resident = lambda shape: pl.BlockSpec(shape, lambda i: (0, 0))

    out = pl.pallas_call(
        mlp_kernel,
        out_shape=jax.ShapeDtypeStruct((1, B), jnp.float32),
        grid=(n_tiles,),
        in_specs=[
            pl.BlockSpec((tm, IN_DIM), lambda i: (i, 0)),       # streamed x
            resident((HIDDEN, IN_DIM)),                         # W1 (bf16)
            resident((HIDDEN, HIDDEN)),                         # W2 (bf16)
            resident((HIDDEN, 3)),                              # [b1|b2|w3]
            pl.BlockSpec(memory_space=pltpu.MemorySpace.SMEM),  # b3 scalar
        ],
        out_specs=pl.BlockSpec((1, tm), lambda i: (0, i)),      # lane-dense out
        compiler_params=pltpu.CompilerParams(
            dimension_semantics=("parallel",),
            vmem_limit_bytes=32 * 1024 * 1024),
    )(x, w1b, w2b, consts, b3)

    return out.reshape(B, 1)


def _round_up(v, m):
    return ((v + m - 1) // m) * m


def choose_tm(batch):
    # Lane-dense multiples of 256; large tiles amortize per-step overhead, and
    # the cdiv(batch,2) term guarantees >= 2 tiles at large B so both v7x
    # TensorCores are used.  VMEM footprint stays ~3 MiB even at TM_MAX.
    return max(256, min(TM_MAX, _round_up(pl.cdiv(batch, 2), 256)))


def prepare_params(w1, b1, w2, b2, w3, b3):
    """One-time prep: cache bf16 weights + pack (b1, b2, w3) into one block."""
    consts = jnp.concatenate([b1, b2, w3], axis=1).astype(jnp.float32)  # (256,3)
    return (w1.astype(jnp.bfloat16), w2.astype(jnp.bfloat16), consts,
            b3.astype(jnp.float32))


def mlp_forward(x, prepared, tm=None):
    """x: (B, 24) f32 -> (B, 1) f32, same semantics as the PyTorch Model."""
    if tm is None:
        tm = choose_tm(x.shape[0])
    w1b, w2b, consts, b3 = prepared
    return _mlp_forward(x, w1b, w2b, consts, b3, tm=tm)


def init_params(key):
    # Deterministic init mimicking PyTorch's default Linear init
    # (uniform in [-1/sqrt(fan_in), 1/sqrt(fan_in)]), torch (out, in) layout.
    def linear(k, fan_in, fan_out):
        kw, kb = jax.random.split(k)
        bound = 1.0 / jnp.sqrt(fan_in)
        w = jax.random.uniform(kw, (fan_out, fan_in), jnp.float32, -bound, bound)
        b = jax.random.uniform(kb, (fan_out, 1), jnp.float32, -bound, bound)
        return w, b

    k1, k2, k3 = jax.random.split(key, 3)
    w1, b1 = linear(k1, IN_DIM, HIDDEN)      # (256, 24), (256, 1)
    w2, b2 = linear(k2, HIDDEN, HIDDEN)      # (256, 256), (256, 1)
    w3r, b3 = linear(k3, HIDDEN, 1)          # (1, 256), (1, 1)
    w3 = w3r.T                               # (256, 1) column for the VPU path
    return w1, b1, w2, b2, w3, b3


def ref_forward(x, w1, b1, w2, b2, w3, b3, emulate_bf16):
    hp = jax.lax.Precision.HIGHEST
    if emulate_bf16:
        x = x.astype(jnp.bfloat16).astype(jnp.float32)
        w1 = w1.astype(jnp.bfloat16).astype(jnp.float32)
        w2 = w2.astype(jnp.bfloat16).astype(jnp.float32)
    h1 = jnp.maximum(jnp.dot(x, w1.T, precision=hp) + b1[:, 0][None, :], 0.0)
    if emulate_bf16:
        h1 = h1.astype(jnp.bfloat16).astype(jnp.float32)
    h2 = jnp.maximum(jnp.dot(h1, w2.T, precision=hp) + b2[:, 0][None, :], 0.0)
    return jnp.dot(h2, w3, precision=hp) + b3[0, 0]


if __name__ == "__main__":
    key = jax.random.PRNGKey(0)
    kx, kp = jax.random.split(key)
    params = init_params(kp)
    prepared = prepare_params(*params)

    # Small single-tile batch + a multi-tile batch with a ragged last block.
    for B in (8, 600):
        x = jax.random.normal(jax.random.fold_in(kx, B), (B, IN_DIM), jnp.float32)

        out = jax.block_until_ready(mlp_forward(x, prepared))
        assert out.shape == (B, 1)

        # Tight check vs. a reference mirroring the kernel's math
        # (bf16 MXU operands, f32 accumulation / epilogue).
        ref_bf16 = ref_forward(x, *params, emulate_bf16=True)
        max_err = float(jnp.max(jnp.abs(out - ref_bf16)))
        assert jnp.allclose(out, ref_bf16, atol=2e-3, rtol=2e-3), (
            "max |err| = %e" % max_err)

        # Loose check vs. the pure-f32 PyTorch-equivalent forward pass.
        ref_f32 = ref_forward(x, *params, emulate_bf16=False)
        assert jnp.allclose(out, ref_f32, atol=5e-2, rtol=5e-2)

    print("KERNEL_OK")
</pallas_src>

<mosaic_0001>
module attributes {stable_mosaic.version = 11 : i64} {
  func.func @mlp_kernel(%arg0: i32, %arg1: memref<256x24xf32, #tpu.memory_space<vmem>>, %arg2: memref<256x24xbf16, #tpu.memory_space<vmem>>, %arg3: memref<256x256xbf16, #tpu.memory_space<vmem>>, %arg4: memref<256x3xf32, #tpu.memory_space<vmem>>, %arg5: memref<1x1xf32, #tpu.memory_space<smem>>, %arg6: memref<1x256xf32, #tpu.memory_space<vmem>>) attributes {dimension_semantics = [#tpu.dimension_semantics<parallel>], iteration_bounds = array<i64: 1>, scalar_prefetch = 0 : i64, scratch_operands = 0 : i64, tpu.core_type = #tpu.core_type<tc>, window_params = [{transform_indices = @transform_0, window_bounds = array<i64: 256, 24>}, {pipeline_mode = #tpu.pipeline_mode<synchronous>, transform_indices = @transform_1, window_bounds = array<i64: 256, 24>}, {pipeline_mode = #tpu.pipeline_mode<synchronous>, transform_indices = @transform_2, window_bounds = array<i64: 256, 256>}, {pipeline_mode = #tpu.pipeline_mode<synchronous>, transform_indices = @transform_3, window_bounds = array<i64: 256, 3>}, {transform_indices = @transform_4, window_bounds = array<i64: 1, 1>}, {transform_indices = @transform_5, window_bounds = array<i64: 1, 256>}]} {
    %c0 = arith.constant 0 : index
    %c0_0 = arith.constant 0 : index
    %0 = vector.load %arg1[%c0, %c0_0] : memref<256x24xf32, #tpu.memory_space<vmem>>, vector<256x24xf32>
    %1 = arith.truncf %0 : vector<256x24xf32> to vector<256x24xbf16>
    %c0_1 = arith.constant 0 : index
    %c0_2 = arith.constant 0 : index
    %2 = vector.load %arg2[%c0_1, %c0_2] : memref<256x24xbf16, #tpu.memory_space<vmem>>, vector<256x24xbf16>
    %cst = arith.constant dense<0.000000e+00> : vector<256x256xf32>
    %3 = tpu.matmul %2, %1, %cst {dimension_numbers = #tpu.dot_dimension_numbers<[1], [1], [0], [0], [0, 0, 1, 0], [], []>} : vector<256x24xbf16>, vector<256x24xbf16>, vector<256x256xf32> -> vector<256x256xf32>
    %c0_3 = arith.constant 0 : index
    %c0_4 = arith.constant 0 : index
    %4 = vector.load %arg4[%c0_3, %c0_4] : memref<256x3xf32, #tpu.memory_space<vmem>>, vector<256x1xf32>
    %5 = vector.broadcast %4 : vector<256x1xf32> to vector<256x256xf32>
    %6 = arith.addf %3, %5 : vector<256x256xf32>
    %cst_5 = arith.constant 0.000000e+00 : f32
    %7 = vector.broadcast %cst_5 : f32 to vector<256x256xf32>
    %8 = arith.maximumf %6, %7 : vector<256x256xf32>
    %9 = arith.truncf %8 : vector<256x256xf32> to vector<256x256xbf16>
    %cst_6 = arith.constant 0.000000e+00 : f32
    %10 = vector.broadcast %cst_6 : f32 to vector<1x256xf32>
    %c0_7 = arith.constant 0 : index
    %c0_8 = arith.constant 0 : index
    %11 = vector.load %arg3[%c0_7, %c0_8] : memref<256x256xbf16, #tpu.memory_space<vmem>>, vector<64x256xbf16>
    %c0_9 = arith.constant 0 : index
    %c1 = arith.constant 1 : index
    %12 = vector.load %arg4[%c0_9, %c1] : memref<256x3xf32, #tpu.memory_space<vmem>>, vector<64x1xf32>
    %c0_10 = arith.constant 0 : index
    %c2 = arith.constant 2 : index
    %13 = vector.load %arg4[%c0_10, %c2] : memref<256x3xf32, #tpu.memory_space<vmem>>, vector<64x1xf32>
    %cst_11 = arith.constant dense<0.000000e+00> : vector<64x256xf32>
    %14 = tpu.matmul %11, %9, %cst_11 {dimension_numbers = #tpu.dot_dimension_numbers<[1], [0], [0], [1], [0, 0, 1, 1], [], []>} : vector<64x256xbf16>, vector<256x256xbf16>, vector<64x256xf32> -> vector<64x256xf32>
    %15 = vector.broadcast %12 : vector<64x1xf32> to vector<64x256xf32>
    %16 = arith.addf %14, %15 : vector<64x256xf32>
    %cst_12 = arith.constant 0.000000e+00 : f32
    %17 = vector.broadcast %cst_12 : f32 to vector<64x256xf32>
    %18 = arith.maximumf %16, %17 : vector<64x256xf32>
    %19 = vector.broadcast %13 : vector<64x1xf32> to vector<64x256xf32>
    %20 = arith.mulf %18, %19 : vector<64x256xf32>
    %cst_13 = arith.constant dense<0.000000e+00> : vector<256xf32>
    %21 = vector.multi_reduction <add>, %20, %cst_13 [0] : vector<64x256xf32> to vector<256xf32>
    %22 = vector.shape_cast %21 : vector<256xf32> to vector<1x256xf32>
    %23 = arith.addf %10, %22 : vector<1x256xf32>
    %c64 = arith.constant 64 : index
    %c0_14 = arith.constant 0 : index
    %24 = vector.load %arg3[%c64, %c0_14] : memref<256x256xbf16, #tpu.memory_space<vmem>>, vector<64x256xbf16>
    %c64_15 = arith.constant 64 : index
    %c1_16 = arith.constant 1 : index
    %25 = vector.load %arg4[%c64_15, %c1_16] : memref<256x3xf32, #tpu.memory_space<vmem>>, vector<64x1xf32>
    %c64_17 = arith.constant 64 : index
    %c2_18 = arith.constant 2 : index
    %26 = vector.load %arg4[%c64_17, %c2_18] : memref<256x3xf32, #tpu.memory_space<vmem>>, vector<64x1xf32>
    %cst_19 = arith.constant dense<0.000000e+00> : vector<64x256xf32>
    %27 = tpu.matmul %24, %9, %cst_19 {dimension_numbers = #tpu.dot_dimension_numbers<[1], [0], [0], [1], [0, 0, 1, 1], [], []>} : vector<64x256xbf16>, vector<256x256xbf16>, vector<64x256xf32> -> vector<64x256xf32>
    %28 = vector.broadcast %25 : vector<64x1xf32> to vector<64x256xf32>
    %29 = arith.addf %27, %28 : vector<64x256xf32>
    %cst_20 = arith.constant 0.000000e+00 : f32
    %30 = vector.broadcast %cst_20 : f32 to vector<64x256xf32>
    %31 = arith.maximumf %29, %30 : vector<64x256xf32>
    %32 = vector.broadcast %26 : vector<64x1xf32> to vector<64x256xf32>
    %33 = arith.mulf %31, %32 : vector<64x256xf32>
    %cst_21 = arith.constant dense<0.000000e+00> : vector<256xf32>
    %34 = vector.multi_reduction <add>, %33, %cst_21 [0] : vector<64x256xf32> to vector<256xf32>
    %35 = vector.shape_cast %34 : vector<256xf32> to vector<1x256xf32>
    %36 = arith.addf %23, %35 : vector<1x256xf32>
    %c128 = arith.constant 128 : index
    %c0_22 = arith.constant 0 : index
    %37 = vector.load %arg3[%c128, %c0_22] : memref<256x256xbf16, #tpu.memory_space<vmem>>, vector<64x256xbf16>
    %c128_23 = arith.constant 128 : index
    %c1_24 = arith.constant 1 : index
    %38 = vector.load %arg4[%c128_23, %c1_24] : memref<256x3xf32, #tpu.memory_space<vmem>>, vector<64x1xf32>
    %c128_25 = arith.constant 128 : index
    %c2_26 = arith.constant 2 : index
    %39 = vector.load %arg4[%c128_25, %c2_26] : memref<256x3xf32, #tpu.memory_space<vmem>>, vector<64x1xf32>
    %cst_27 = arith.constant dense<0.000000e+00> : vector<64x256xf32>
    %40 = tpu.matmul %37, %9, %cst_27 {dimension_numbers = #tpu.dot_dimension_numbers<[1], [0], [0], [1], [0, 0, 1, 1], [], []>} : vector<64x256xbf16>, vector<256x256xbf16>, vector<64x256xf32> -> vector<64x256xf32>
    %41 = vector.broadcast %38 : vector<64x1xf32> to vector<64x256xf32>
    %42 = arith.addf %40, %41 : vector<64x256xf32>
    %cst_28 = arith.constant 0.000000e+00 : f32
    %43 = vector.broadcast %cst_28 : f32 to vector<64x256xf32>
    %44 = arith.maximumf %42, %43 : vector<64x256xf32>
    %45 = vector.broadcast %39 : vector<64x1xf32> to vector<64x256xf32>
    %46 = arith.mulf %44, %45 : vector<64x256xf32>
    %cst_29 = arith.constant dense<0.000000e+00> : vector<256xf32>
    %47 = vector.multi_reduction <add>, %46, %cst_29 [0] : vector<64x256xf32> to vector<256xf32>
    %48 = vector.shape_cast %47 : vector<256xf32> to vector<1x256xf32>
    %49 = arith.addf %36, %48 : vector<1x256xf32>
    %c192 = arith.constant 192 : index
    %c0_30 = arith.constant 0 : index
    %50 = vector.load %arg3[%c192, %c0_30] : memref<256x256xbf16, #tpu.memory_space<vmem>>, vector<64x256xbf16>
    %c192_31 = arith.constant 192 : index
    %c1_32 = arith.constant 1 : index
    %51 = vector.load %arg4[%c192_31, %c1_32] : memref<256x3xf32, #tpu.memory_space<vmem>>, vector<64x1xf32>
    %c192_33 = arith.constant 192 : index
    %c2_34 = arith.constant 2 : index
    %52 = vector.load %arg4[%c192_33, %c2_34] : memref<256x3xf32, #tpu.memory_space<vmem>>, vector<64x1xf32>
    %cst_35 = arith.constant dense<0.000000e+00> : vector<64x256xf32>
    %53 = tpu.matmul %50, %9, %cst_35 {dimension_numbers = #tpu.dot_dimension_numbers<[1], [0], [0], [1], [0, 0, 1, 1], [], []>} : vector<64x256xbf16>, vector<256x256xbf16>, vector<64x256xf32> -> vector<64x256xf32>
    %54 = vector.broadcast %51 : vector<64x1xf32> to vector<64x256xf32>
    %55 = arith.addf %53, %54 : vector<64x256xf32>
    %cst_36 = arith.constant 0.000000e+00 : f32
    %56 = vector.broadcast %cst_36 : f32 to vector<64x256xf32>
    %57 = arith.maximumf %55, %56 : vector<64x256xf32>
    %58 = vector.broadcast %52 : vector<64x1xf32> to vector<64x256xf32>
    %59 = arith.mulf %57, %58 : vector<64x256xf32>
    %cst_37 = arith.constant dense<0.000000e+00> : vector<256xf32>
    %60 = vector.multi_reduction <add>, %59, %cst_37 [0] : vector<64x256xf32> to vector<256xf32>
    %61 = vector.shape_cast %60 : vector<256xf32> to vector<1x256xf32>
    %62 = arith.addf %49, %61 : vector<1x256xf32>
    %c0_38 = arith.constant 0 : index
    %c0_39 = arith.constant 0 : index
    %63 = memref.load %arg5[%c0_38, %c0_39] : memref<1x1xf32, #tpu.memory_space<smem>>
    %64 = vector.broadcast %63 : f32 to vector<1x256xf32>
    %65 = arith.addf %62, %64 : vector<1x256xf32>
    %c0_40 = arith.constant 0 : index
    %c0_41 = arith.constant 0 : index
    %66 = vector.load %arg6[%c0_40, %c0_41] : memref<1x256xf32, #tpu.memory_space<vmem>>, vector<1x256xf32>
    tpu.vector_store %arg6[%c0_40, %c0_41], %65 {strides = array<i32>} : memref<1x256xf32, #tpu.memory_space<vmem>>, vector<1x256xf32>,
    return
  }
  func.func @transform_0(%arg0: i32) -> (i32, i32) {
    %c0_i32 = arith.constant 0 : i32
    %c0_i32_0 = arith.constant 0 : i32
    return %arg0, %c0_i32 : i32, i32
  }
  func.func @transform_1(%arg0: i32) -> (i32, i32) {
    %c0_i32 = arith.constant 0 : i32
    %c0_i32_0 = arith.constant 0 : i32
    %c0_i32_1 = arith.constant 0 : i32
    return %c0_i32, %c0_i32_0 : i32, i32
  }
  func.func @transform_2(%arg0: i32) -> (i32, i32) {
    %c0_i32 = arith.constant 0 : i32
    %c0_i32_0 = arith.constant 0 : i32
    %c0_i32_1 = arith.constant 0 : i32
    return %c0_i32, %c0_i32_0 : i32, i32
  }
  func.func @transform_3(%arg0: i32) -> (i32, i32) {
    %c0_i32 = arith.constant 0 : i32
    %c0_i32_0 = arith.constant 0 : i32
    %c0_i32_1 = arith.constant 0 : i32
    return %c0_i32, %c0_i32_0 : i32, i32
  }
  func.func @transform_4(%arg0: i32) -> (i32, i32) {
    %c0_i32 = arith.constant 0 : i32
    %c0_i32_0 = arith.constant 0 : i32
    %c0_i32_1 = arith.constant 0 : i32
    return %c0_i32, %c0_i32_0 : i32, i32
  }
  func.func @transform_5(%arg0: i32) -> (i32, i32) {
    %c0_i32 = arith.constant 0 : i32
    %c0_i32_0 = arith.constant 0 : i32
    return %c0_i32, %arg0 : i32, i32
  }
}

</mosaic_0001>

<bundles_post_ra>
// kernel: _mlp_forward.1
= control target key start
LH: loop header
LB: loop body
LE: loop exit
PB: predicated region body
PF: predicated region fallthrough
CT: control target
= control target key end

     0   :  { %11 = vsyncpa [#allocation4], 0  ;;  %vm375_vm0 = vcmask 195584   ;;  %v2060_v28 = vmov 0   ;;  %s3103_s0 = inlined_call_operand.vmem [shape: f32[8,24], index: 0, kind: input, shape index: {}]   ;;  %s3104_s1 = inlined_call_operand.vmem [shape: bf16[256,24], index: 1, kind: input, shape index: {}]   ;;  %s3105_s2 = inlined_call_operand.vmem [shape: bf16[256,256], index: 2, kind: input, shape index: {}]   ;;  %s3106_s3 = inlined_call_operand.vmem [shape: f32[256,3], index: 3, kind: input, shape index: {}]   ;;  %s3107_s4 = inlined_call_operand.<no memory space> [shape: f32[1,1], index: 4, kind: input, shape index: {}]   ;;  %s3108_s5 = inlined_call_operand.hbm [shape: f32[1,8], index: 5, kind: output, shape index: {}]  }
   0x1   :  { %v39_v0 = vld [vmem:[%s3103_s0 + $0x80] sm:$0xff]  ;;  %v40_v1 = vld [vmem:[%s3103_s0 + $0x88] sm:$0xff]  ;;  %v41_v5 = vld [vmem:[%s3103_s0 + $0x90] sm:$0xff]  ;;  %1955 = vset.pattern.permute.xlu0 %v2060_v28  ;;  %1956 = vset.pattern.permute.xlu1 %v2060_v28 }
   0x2   :  { %v63_v2 = vpack.c.bf16 %v40_v1, %v39_v0  ;;  %v23_v3 = vld [vmem:[%s3103_s0] sm:$0xff]  ;;  %v24_v4 = vld [vmem:[%s3103_s0 + $0x8] sm:$0xff]  ;;  %v42_v7 = vld [vmem:[%s3103_s0 + $0x98] sm:$0xff] }
   0x3   :  { %v55_v6 = vpack.c.bf16 %v24_v4, %v23_v3  ;;  %v64_v8 = vpack.c.bf16 %v42_v7, %v41_v5  ;;  %v25_v9 = vld [vmem:[%s3103_s0 + $0x10] sm:$0xff]  ;;  %v26_v10 = vld [vmem:[%s3103_s0 + $0x18] sm:$0xff]  ;;  %v43_v13 = vld [vmem:[%s3103_s0 + $0xa0] sm:$0xff] }
   0x4   :  { %1942 = vmatprep.subr.msk.bf16.mxu0 %vm375_vm0, %v63_v2  ;;  %v56_v12 = vpack.c.bf16 %v26_v10, %v25_v9  ;;  %v44_v14 = vld [vmem:[%s3103_s0 + $0xa8] sm:$0xff]  ;;  %v27_v17 = vld [vmem:[%s3103_s0 + $0x20] sm:$0xff]  ;;  %v45_v21 = vld [vmem:[%s3103_s0 + $0xb0] sm:$0xff] }
   0x5   :  { %v425_v11 = vsel %vm375_vm0, %v55_v6, 0  ;;  %v65_v16 = vpack.c.bf16 %v44_v14, %v43_v13  ;;  %v28_v18 = vld [vmem:[%s3103_s0 + $0x28] sm:$0xff]  ;;  %v2138_v19 = vld [vmem:[%s3104_s1] sm:$0xff]   ;;  %v46_v22 = vld [vmem:[%s3103_s0 + $0xb8] sm:$0xff] }
   0x6   :  { %1895 = vmatpush3.bf16.xpose.msra.mxu0 %v425_v11  ;;  %v428_v15 = vsel %vm375_vm0, %v56_v12, 0  ;;  %1910 = vmatprep.mubr.msk.bf16.mxu0 %vm375_vm0, %v2138_v19  ;;  %v57_v20 = vpack.c.bf16 %v28_v18, %v27_v17  ;;  %v66_v24 = vpack.c.bf16 %v46_v22, %v45_v21  ;;  %v29_v25 = vld [vmem:[%s3103_s0 + $0x30] sm:$0xff]  ;;  %v30_v26 = vld [vmem:[%s3103_s0 + $0x38] sm:$0xff]  ;;  %v47_v27 = vld [vmem:[%s3103_s0 + $0xc0] sm:$0xff] }
   0x7   :  { %1943 = vmatprep.subr.msk.bf16.mxu0 %vm375_vm0, %v64_v8  ;;  %v58_v29 = vpack.c.bf16 %v30_v26, %v29_v25  ;;  %v48_v30 = vld [vmem:[%s3103_s0 + $0xc8] sm:$0xff]  ;;  %v2166_v31 = vld [vmem:[%s3106_s3] sm:$0xff]  ;;  %v2171_v32 = vld [vmem:[%s3106_s3 + $0x10] sm:$0xff] }
   0x8   :  { %v431_v23 = vsel %vm375_vm0, %v57_v20, 0  ;;  %137 = vperm.xlu0 %1955, %v2166_v31   ;;  %v2177_v33 = vld [vmem:[%s3106_s3 + $0x8] sm:$0xff]  ;;  %147 = vperm.xlu1 %1956, %v2171_v32   ;;  %v31_v34 = vld [vmem:[%s3103_s0 + $0x40] sm:$0xff]  ;;  %v67_v37 = vpack.c.bf16 %v48_v30, %v47_v27  ;;  %v2191_v38 = vld [vmem:[%s3106_s3 + $0x18] sm:$0xff] }
   0x9   :  { %v32_v35 = vld [vmem:[%s3103_s0 + $0x48] sm:$0xff]  ;;  %v434_v36 = vsel %vm375_vm0, %v58_v29, 0  ;;  %v2196_v39 = vld [vmem:[%s3106_s3 + $0x20] sm:$0xff]  ;;  %v49_v40 = vld [vmem:[%s3103_s0 + $0xd0] sm:$0xff] }
   0xa   :  { %v50_v41 = vld [vmem:[%s3103_s0 + $0xd8] sm:$0xff]  ;;  %v2208_v42 = vld [vmem:[%s3106_s3 + $0x28] sm:$0xff]  ;;  %v59_v43 = vpack.c.bf16 %v32_v35, %v31_v34  ;;  %v2214_v44 = vld [vmem:[%s3106_s3 + $0x30] sm:$0xff] }
   0xb   :  { %v33_v45 = vld [vmem:[%s3103_s0 + $0x50] sm:$0xff]  ;;  %v34_v46 = vld [vmem:[%s3103_s0 + $0x58] sm:$0xff]  ;;  %v68_v48 = vpack.c.bf16 %v50_v41, %v49_v40  ;;  %v2234_v50 = vld [vmem:[%s3106_s3 + $0x40] sm:$0xff] }
   0xc   :  { %142 = vperm.xlu0 %1955, %v2177_v33   ;;  %152 = vperm.xlu1 %1956, %v2191_v38   ;;  %v437_v47 = vsel %vm375_vm0, %v59_v43, 0  ;;  %v2229_v49 = vld [vmem:[%s3106_s3 + $0x38] sm:$0xff]  ;;  %v51_v51 = vld [vmem:[%s3103_s0 + $0xe0] sm:$0xff]  ;;  %v52_v52 = vld [vmem:[%s3103_s0 + $0xe8] sm:$0xff]  ;;  %v60_v54 = vpack.c.bf16 %v34_v46, %v33_v45 }
   0xd   :  { %v2246_v53 = vld [vmem:[%s3106_s3 + $0x48] sm:$0xff]  ;;  %v2253_v55 = vld [vmem:[%s3106_s3 + $0x50] sm:$0xff]  ;;  %v69_v57 = vpack.c.bf16 %v52_v52, %v51_v51  ;;  %v35_v58 = vld [vmem:[%s3103_s0 + $0x60] sm:$0xff]  ;;  %v2061_v51 = vmov 1  }
   0xe   :  { %1897 = vmatpush3.bf16.xpose.msra.mxu0 %v428_v15  ;;  %v440_v56 = vsel %vm375_vm0, %v60_v54, 0  ;;  %v36_v59 = vld [vmem:[%s3103_s0 + $0x68] sm:$0xff]  ;;  %v2267_v60 = vld [vmem:[%s3106_s3 + $0x58] sm:$0xff]  ;;  %v2272_v61 = vld [vmem:[%s3106_s3 + $0x60] sm:$0xff] }
   0xf   :  { %1944 = vmatprep.subr.msk.bf16.mxu0 %vm375_vm0, %v65_v16  ;;  %v61_v62 = vpack.c.bf16 %v36_v59, %v35_v58  ;;  %v2279_v63 = vld [vmem:[%s3106_s3 + $0x68] sm:$0xff]  ;;  %v53_v0 = vld [vmem:[%s3103_s0 + $0xf0] sm:$0xff]  ;;  %v54_v1 = vld [vmem:[%s3103_s0 + $0xf8] sm:$0xff] }
  0x10   :  { %157 = vperm.xlu0 %1955, %v2196_v39   ;;  %162 = vperm.xlu1 %1956, %v2208_v42   ;;  %v2291_v2 = vld [vmem:[%s3106_s3 + $0x70] sm:$0xff]  ;;  %v70_v4 = vpack.c.bf16 %v54_v1, %v53_v0  ;;  %v38_v6 = vld [vmem:[%s3103_s0 + $0x78] sm:$0xff]  ;;  %v119_v8 = vld [vmem:[%s3106_s3 + $0x80] sm:$0xff] }
  0x11   :  { %v443_v3 = vsel %vm375_vm0, %v61_v62, 0  ;;  %v37_v5 = vld [vmem:[%s3103_s0 + $0x70] sm:$0xff]  ;;  %v2305_v7 = vld [vmem:[%s3106_s3 + $0x78] sm:$0xff]  ;;  %v2315_v10 = vld [vmem:[%s3106_s3 + $0x88] sm:$0xff] }
  0x12   :  { %v62_v9 = vpack.c.bf16 %v38_v6, %v37_v5  ;;  %v2320_v11 = vld [vmem:[%s3106_s3 + $0x90] sm:$0xff]  ;;  %v2328_v13 = vld [vmem:[%s3106_s3 + $0x98] sm:$0xff]  ;;  %v2333_v14 = vld [vmem:[%s3106_s3 + $0xa0] sm:$0xff] }
  0x13   :  { %v124_v15 = vld [vmem:[%s3106_s3 + $0xa8] sm:$0xff]  ;;  %v125_v16 = vld [vmem:[%s3106_s3 + $0xb0] sm:$0xff]  ;;  %v126_v18 = vld [vmem:[%s3106_s3 + $0xb8] sm:$0xff] }
  0x14   :  { %167 = vperm.xlu0 %1955, %v2214_v44   ;;  %172 = vperm.xlu1 %1956, %v2229_v49   ;;  %v446_v12 = vsel %vm375_vm0, %v62_v9, 0  ;;  %v1973_v17 = vld [vmem:[%s3104_s1 + $0x8] sm:$0xff]   ;;  %v2354_v20 = vld [vmem:[%s3106_s3 + $0xc0] sm:$0xff]  ;;  %v2366_v22 = vld [vmem:[%s3106_s3 + $0xd0] sm:$0xff] }
  0x15   :  { %v2360_v21 = vld [vmem:[%s3106_s3 + $0xc8] sm:$0xff]  ;;  %v2395_v26 = vld [vmem:[%s3106_s3 + $0xf0] sm:$0xff]  ;;  %v1975_v27 = vld [vmem:[%s3104_s1 + $0x18] sm:$0xff]  }
  0x16   :  { %1899 = vmatpush3.bf16.xpose.msra.mxu0 %v431_v23  ;;  %v2375_v23 = vld [vmem:[%s3106_s3 + $0xd8] sm:$0xff]  ;;  %v2389_v25 = vld [vmem:[%s3106_s3 + $0xe8] sm:$0xff]  ;;  %v1976_v29 = vld [vmem:[%s3104_s1 + $0x20] sm:$0xff]  }
  0x17   :  { %1945 = vmatprep.subr.msk.bf16.mxu0 %vm375_vm0, %v66_v24  ;;  %v2382_v24 = vld [vmem:[%s3106_s3 + $0xe0] sm:$0xff]  ;;  %v2404_v28 = vld [vmem:[%s3106_s3 + $0xf8] sm:$0xff]  ;;  %v1977_v30 = vld [vmem:[%s3104_s1 + $0x28] sm:$0xff]  }
  0x18   :  { %177 = vperm.xlu0 %1955, %v2234_v50   ;;  %182 = vperm.xlu1 %1956, %v2246_v53   ;;  %v1978_v34 = vld [vmem:[%s3104_s1 + $0x30] sm:$0xff]   ;;  %v1979_v35 = vld [vmem:[%s3104_s1 + $0x38] sm:$0xff]   ;;  %v1984_v43 = vld [vmem:[%s3104_s1 + $0x60] sm:$0xff]  }
  0x19   :  { %v1982_v40 = vld [vmem:[%s3104_s1 + $0x50] sm:$0xff]   ;;  %v1983_v41 = vld [vmem:[%s3104_s1 + $0x58] sm:$0xff]   ;;  %v1985_v45 = vld [vmem:[%s3104_s1 + $0x68] sm:$0xff]  }
  0x1a   :  { %v1986_v46 = vld [vmem:[%s3104_s1 + $0x70] sm:$0xff]   ;;  %v1990_v1 = vld [vmem:[%s3105_s2 + $0x4] ss:$8 sps:$4 sm:$0xff]  }
  0x1b   :  { %889 = vmatprep.mubr.bf16.mxu1 %v1990_v1 }
  0x1c   :  { %187 = vperm.xlu0 %1955, %v2253_v55   ;;  %192 = vperm.xlu1 %1956, %v2267_v60  }
  0x1e   :  { %1901 = vmatpush3.bf16.xpose.msra.mxu0 %v434_v36  ;;  %v1980_v36 = vld [vmem:[%s3104_s1 + $0x40] sm:$0xff]  }
  0x1f   :  { %1946 = vmatprep.subr.msk.bf16.mxu0 %vm375_vm0, %v67_v37  ;;  %v1981_v37 = vld [vmem:[%s3104_s1 + $0x48] sm:$0xff]  }
  0x20   :  { %197 = vperm.xlu0 %1955, %v2272_v61   ;;  %202 = vperm.xlu1 %1956, %v2279_v63  }
  0x24   :  { %207 = vperm.xlu0 %1955, %v2291_v2   ;;  %212 = vperm.xlu1 %1956, %v2305_v7  }
  0x26   :  { %1903 = vmatpush3.bf16.xpose.msra.mxu0 %v437_v47  ;;  %v1987_v47 = vld [vmem:[%s3104_s1 + $0x78] sm:$0xff]  }
  0x27   :  { %1947 = vmatprep.subr.msk.bf16.mxu0 %vm375_vm0, %v68_v48 }
  0x28   :  { %217 = vperm.xlu0 %1955, %v119_v8   ;;  %222 = vperm.xlu1 %1956, %v2315_v10  }
  0x2c   :  { %227 = vperm.xlu0 %1955, %v2320_v11   ;;  %232 = vperm.xlu1 %1956, %v2328_v13  }
  0x2e   :  { %1905 = vmatpush3.bf16.xpose.msra.mxu0 %v440_v56 }
  0x2f   :  { %1948 = vmatprep.subr.msk.bf16.mxu0 %vm375_vm0, %v69_v57 }
  0x30   :  { %237 = vperm.xlu0 %1955, %v2333_v14   ;;  %242 = vperm.xlu1 %1956, %v124_v15  }
  0x34   :  { %247 = vperm.xlu0 %1955, %v125_v16   ;;  %252 = vperm.xlu1 %1956, %v126_v18  }
  0x36   :  { %1907 = vmatpush3.bf16.xpose.msra.mxu0 %v443_v3 }
  0x37   :  { %1949 = vmatprep.subr.msk.bf16.mxu0 %vm375_vm0, %v70_v4 }
  0x38   :  { %257 = vperm.xlu0 %1955, %v2354_v20   ;;  %262 = vperm.xlu1 %1956, %v2360_v21  }
  0x3c   :  { %267 = vperm.xlu0 %1955, %v2366_v22   ;;  %272 = vperm.xlu1 %1956, %v2375_v23  }
  0x3e   :  { %1909 = vmatpush3.bf16.xpose.msra.mxu0 %v446_v12 }
  0x40   :  { %277 = vperm.xlu0 %1955, %v2382_v24   ;;  %282 = vperm.xlu1 %1956, %v2389_v25  }
  0x44   :  { %287 = vperm.xlu0 %1955, %v2395_v26   ;;  %292 = vperm.xlu1 %1956, %v2404_v28  }
  0x45   :  { %1911 = vmatmul.mubr.msk.bf16.vlgmr.msra.gmra.mrb[0].mxu0 %vm375_vm0, %v2138_v19  ;;  %v1974_v19 = vld [vmem:[%s3104_s1 + $0x10] sm:$0xff]  }
  0x46   :  { %1912 = vmatprep.mubr.msk.bf16.mxu0 %vm375_vm0, %v1973_v17 }
  0x48   :  { %1957 = vset.pattern.permute.xlu1 %v2061_v51 }
  0x49   :  { %784 = vperm.xlu1 %1957, %v2177_v33  }
  0x4d   :  { %1913 = vmatmul.mubr.msk.bf16.gmra.mrb[4].mxu0 %vm375_vm0, %v1973_v17  ;;  %789 = vperm.xlu1 %1957, %v2171_v32  }
  0x4e   :  { %1914 = vmatprep.mubr.msk.bf16.mxu0 %vm375_vm0, %v1974_v19 }
  0x51   :  { %799 = vperm.xlu1 %1957, %v2196_v39  }
  0x55   :  { %1915 = vmatmul.mubr.msk.bf16.gmra.mrb[8].mxu0 %vm375_vm0, %v1974_v19  ;;  %809 = vperm.xlu1 %1957, %v2214_v44  }
  0x56   :  { %1916 = vmatprep.mubr.msk.bf16.mxu0 %vm375_vm0, %v1975_v27 }
  0x5d   :  { %1917 = vmatmul.mubr.msk.bf16.gmra.mrb[12].mxu0 %vm375_vm0, %v1975_v27 }
  0x5e   :  { %1918 = vmatprep.mubr.msk.bf16.mxu0 %vm375_vm0, %v1976_v29 }
  0x65   :  { %1919 = vmatmul.mubr.msk.bf16.gmra.mrb[16].mxu0 %vm375_vm0, %v1976_v29 }
  0x66   :  { %1920 = vmatprep.mubr.msk.bf16.mxu0 %vm375_vm0, %v1977_v30 }
  0x6d   :  { %1921 = vmatmul.mubr.msk.bf16.gmra.mrb[20].mxu0 %vm375_vm0, %v1977_v30 }
  0x6e   :  { %1922 = vmatprep.mubr.msk.bf16.mxu0 %vm375_vm0, %v1978_v34 }
  0x75   :  { %1923 = vmatmul.mubr.msk.bf16.gmra.mrb[24].mxu0 %vm375_vm0, %v1978_v34 }
  0x76   :  { %1924 = vmatprep.mubr.msk.bf16.mxu0 %vm375_vm0, %v1979_v35 }
  0x7d   :  { %1925 = vmatmul.mubr.msk.bf16.gmra.mrb[28].mxu0 %vm375_vm0, %v1979_v35 }
  0x7e   :  { %1926 = vmatprep.mubr.msk.bf16.mxu0 %vm375_vm0, %v1980_v36 }
  0x85   :  { %1927 = vmatmul.mubr.msk.bf16.gmra.mrb[32].mxu0 %vm375_vm0, %v1980_v36 }
  0x86   :  { %1928 = vmatprep.mubr.msk.bf16.mxu0 %vm375_vm0, %v1981_v37 }
  0x87   :  { %v138_v48 = vpop.permute.xlu0 %137  ;;  %v148_v3 = vpop.permute.xlu1 %147 }
  0x8b   :  { %v143_v54 = vpop.permute.xlu0 %142  ;;  %v153_v19 = vpop.permute.xlu1 %152 }
  0x8d   :  { %1929 = vmatmul.mubr.msk.bf16.gmra.mrb[36].mxu0 %vm375_vm0, %v1981_v37 }
  0x8e   :  { %1930 = vmatprep.mubr.msk.bf16.mxu0 %vm375_vm0, %v1982_v40 }
  0x95   :  { %1931 = vmatmul.mubr.msk.bf16.gmra.mrb[40].mxu0 %vm375_vm0, %v1982_v40  ;;  %v2062_v40 = vmov 2  }
  0x96   :  { %1932 = vmatprep.mubr.msk.bf16.mxu0 %vm375_vm0, %v1983_v41  ;;  %1959 = vset.pattern.permute.xlu0 %v2062_v40 }
  0x97   :  { %951 = vperm.xlu0 %1959, %v2177_v33   ;;  %1958 = vset.pattern.permute.xlu1 %v2062_v40 }
  0x98   :  { %947 = vperm.xlu1 %1958, %v2166_v31  }
  0x9b   :  { %963 = vperm.xlu0 %1959, %v2196_v39  }
  0x9c   :  { %955 = vperm.xlu1 %1958, %v2171_v32  }
  0x9d   :  { %1933 = vmatmul.mubr.msk.bf16.gmra.mrb[44].mxu0 %vm375_vm0, %v1983_v41 }
  0x9e   :  { %1934 = vmatprep.mubr.msk.bf16.mxu0 %vm375_vm0, %v1984_v43 }
  0x9f   :  { %971 = vperm.xlu0 %1959, %v2214_v44  }
  0xa0   :  { %959 = vperm.xlu1 %1958, %v2191_v38  }
  0xa3   :  { %1212 = vperm.xlu0 %1959, %v2246_v53  }
  0xa4   :  { %967 = vperm.xlu1 %1958, %v2208_v42  }
  0xa5   :  { %1935 = vmatmul.mubr.msk.bf16.gmra.mrb[48].mxu0 %vm375_vm0, %v1984_v43 }
  0xa6   :  { %1936 = vmatprep.mubr.msk.bf16.mxu0 %vm375_vm0, %v1985_v45 }
  0xa7   :  { %1224 = vperm.xlu0 %1959, %v2272_v61  }
  0xa8   :  { %975 = vperm.xlu1 %1958, %v2229_v49  }
  0xab   :  { %1232 = vperm.xlu0 %1959, %v2291_v2  }
  0xac   :  { %1960 = vset.pattern.permute.xlu1 %v2061_v51 }
  0xad   :  { %1937 = vmatmul.mubr.msk.bf16.gmra.mrb[52].mxu0 %vm375_vm0, %v1985_v45  ;;  %1045 = vperm.xlu1 %1960, %v2246_v53  }
  0xae   :  { %1938 = vmatprep.mubr.msk.bf16.mxu0 %vm375_vm0, %v1986_v46 }
  0xaf   :  { %1473 = vperm.xlu0 %1959, %v2315_v10  }
  0xb1   :  { %1050 = vperm.xlu1 %1960, %v2253_v55  }
  0xb3   :  { %1481 = vperm.xlu0 %1959, %v2328_v13  }
  0xb5   :  { %1939 = vmatmul.mubr.msk.bf16.gmra.mrb[56].mxu0 %vm375_vm0, %v1986_v46  ;;  %v158_v46 = vpop.permute.xlu0 %157  ;;  %1060 = vperm.xlu1 %1960, %v2272_v61  }
  0xb6   :  { %1940 = vmatprep.mubr.msk.bf16.mxu0 %vm375_vm0, %v1987_v47 }
  0xb7   :  { %1726 = vperm.xlu0 %1959, %v2375_v23  }
  0xb9   :  { %1070 = vperm.xlu1 %1960, %v2291_v2  }
  0xbb   :  { %1969 = vset.pattern.permute.xlu0 %v2061_v51 }
  0xbc   :  { %779 = vperm.xlu0 %1969, %v2166_v31  }
  0xbd   :  { %1941 = vmatmul.mubr.msk.bf16.gmra.mrb[60].mxu0 %vm375_vm0, %v1987_v47  ;;  %1961 = vset.pattern.permute.xlu1 %v2062_v40 }
  0xbe   :  { %1208 = vperm.xlu1 %1961, %v2234_v50  }
  0xc0   :  { %794 = vperm.xlu0 %1969, %v2191_v38  }
  0xc2   :  { %1216 = vperm.xlu1 %1961, %v2253_v55  }
  0xc4   :  { %804 = vperm.xlu0 %1969, %v2208_v42  }
  0xc6   :  { %1220 = vperm.xlu1 %1961, %v2267_v60  }
  0xc8   :  { %814 = vperm.xlu0 %1969, %v2229_v49  }
  0xca   :  { %1228 = vperm.xlu1 %1961, %v2279_v63  }
  0xcc   :  { %1040 = vperm.xlu0 %1969, %v2234_v50  }
  0xce   :  { %1236 = vperm.xlu1 %1961, %v2305_v7  }
  0xd0   :  { %1055 = vperm.xlu0 %1969, %v2267_v60  }
  0xd2   :  { %1962 = vset.pattern.permute.xlu1 %v2061_v51 }
  0xd3   :  { %1306 = vperm.xlu1 %1962, %v2315_v10  }
  0xd4   :  { %1065 = vperm.xlu0 %1969, %v2279_v63  }
  0xd7   :  { %1311 = vperm.xlu1 %1962, %v2320_v11  }
  0xd8   :  { %1075 = vperm.xlu0 %1969, %v2305_v7  }
  0xdb   :  { %1321 = vperm.xlu1 %1962, %v2333_v14  }
  0xdf   :  { %1553 = vperm.xlu1 %1962, %v2354_v20  }
  0xe3   :  { %1963 = vset.pattern.permute.xlu1 %v2062_v40 }
 0x118   :  { %v506_v52 = vpop.f32.mrb[0].mxu0 }
 0x119   :  { %v507_v56 = vadd.f32 %v506_v52, %v138_v48  ;;  %v508_v57 = vpop.f32.mrb[1].mxu0 }
 0x11a   :  { %v509_v58 = vadd.f32 %v508_v57, %v138_v48  ;;  %v510_v59 = vpop.f32.mrb[2].mxu0 }
 0x11b   :  { %v511_v62 = vadd.f32 %v510_v59, %v143_v54  ;;  %v512_v0 = vpop.f32.mrb[3].mxu0  ;;  %v665_v5 = vmax.f32 %v507_v56, 0.0  ;;  %v163_v56 = vpop.permute.xlu1 %162 }
 0x11c   :  { %v513_v4 = vadd.f32 %v512_v0, %v143_v54  ;;  %v666_v8 = vmax.f32 %v509_v58, 0.0 }
 0x11d   :  { %v667_v6 = vmax.f32 %v511_v62, 0.0 }
 0x11e   :  { %v668_v9 = vmax.f32 %v513_v4, 0.0 }
 0x11f   :  { %v2478_v12 = vpack.c.bf16 %v667_v6, %v665_v5  ;;  %v168_v6 = vpop.permute.xlu0 %167 }
 0x120   :  { %v2480_v15 = vpack.c.bf16 %v668_v9, %v666_v8  ;;  %v516_v16 = vpop.f32.mrb[4].mxu0 }
 0x121   :  { %v517_v17 = vadd.f32 %v516_v16, %v148_v3  ;;  %v518_v18 = vpop.f32.mrb[5].mxu0 }
 0x122   :  { %v519_v27 = vadd.f32 %v518_v18, %v148_v3  ;;  %v520_v29 = vpop.f32.mrb[6].mxu0  ;;  %857 = vmatprep.subr.bf16.mxu1 %v2480_v15  ;;  %1379 = vmatprep.subr.bf16.mxu0 %v2480_v15  ;;  %v173_v18 = vpop.permute.xlu1 %172 }
 0x123   :  { %v521_v30 = vadd.f32 %v520_v29, %v153_v19  ;;  %v522_v34 = vpop.f32.mrb[7].mxu0  ;;  %858 = vmatpush1.bf16.msra.mxu1 %v2478_v12  ;;  %1380 = vmatpush1.bf16.msra.mxu0 %v2478_v12  ;;  %v669_v36 = vmax.f32 %v517_v17, 0.0 }
 0x124   :  { %v523_v35 = vadd.f32 %v522_v34, %v153_v19  ;;  %v670_v41 = vmax.f32 %v519_v27, 0.0  ;;  %v2002_v34 = vld [vmem:[%s3105_s2 + $0x84] ss:$8 sps:$4 sm:$0xff]  }
 0x125   :  { %v671_v37 = vmax.f32 %v521_v30, 0.0  ;;  %1411 = vmatprep.mubr.bf16.mxu0 %v2002_v34 }
 0x126   :  { %v672_v43 = vmax.f32 %v523_v35, 0.0 }
 0x127   :  { %v2489_v45 = vpack.c.bf16 %v671_v37, %v669_v36 }
 0x128   :  { %v2491_v47 = vpack.c.bf16 %v672_v43, %v670_v41  ;;  %v526_v48 = vpop.f32.mrb[8].mxu0  ;;  %v178_v41 = vpop.permute.xlu0 %177 }
 0x129   :  { %v527_v52 = vadd.f32 %v526_v48, %v158_v46  ;;  %v528_v54 = vpop.f32.mrb[9].mxu0 }
 0x12a   :  { %v529_v57 = vadd.f32 %v528_v54, %v158_v46  ;;  %v530_v58 = vpop.f32.mrb[10].mxu0  ;;  %859 = vmatprep.subr.bf16.mxu1 %v2491_v47  ;;  %1381 = vmatprep.subr.bf16.mxu0 %v2491_v47  ;;  %v183_v54 = vpop.permute.xlu1 %182 }
 0x12b   :  { %v531_v33 = vadd.f32 %v530_v58, %v163_v56  ;;  %v532_v59 = vpop.f32.mrb[11].mxu0  ;;  %860 = vmatpush1.bf16.msra.mxu1 %v2489_v45  ;;  %1382 = vmatpush1.bf16.msra.mxu0 %v2489_v45  ;;  %v673_v0 = vmax.f32 %v527_v52, 0.0 }
 0x12c   :  { %v533_v62 = vadd.f32 %v532_v59, %v163_v56  ;;  %v674_v3 = vmax.f32 %v529_v57, 0.0 }
 0x12d   :  { %v675_v1 = vmax.f32 %v531_v33, 0.0 }
 0x12e   :  { %v676_v4 = vmax.f32 %v533_v62, 0.0 }
 0x12f   :  { %v2501_v5 = vpack.c.bf16 %v675_v1, %v673_v0 }
 0x130   :  { %v2503_v8 = vpack.c.bf16 %v676_v4, %v674_v3  ;;  %v536_v9 = vpop.f32.mrb[12].mxu0 }
 0x131   :  { %v537_v16 = vadd.f32 %v536_v9, %v168_v6  ;;  %v538_v17 = vpop.f32.mrb[13].mxu0 }
 0x132   :  { %v539_v39 = vadd.f32 %v538_v17, %v168_v6  ;;  %v540_v19 = vpop.f32.mrb[14].mxu0  ;;  %861 = vmatprep.subr.bf16.mxu1 %v2503_v8  ;;  %1383 = vmatprep.subr.bf16.mxu0 %v2503_v8  ;;  %v188_v6 = vpop.permute.xlu0 %187 }
 0x133   :  { %v541_v32 = vadd.f32 %v540_v19, %v173_v18  ;;  %v542_v27 = vpop.f32.mrb[15].mxu0  ;;  %862 = vmatpush1.bf16.msra.mxu1 %v2501_v5  ;;  %1384 = vmatpush1.bf16.msra.mxu0 %v2501_v5  ;;  %v677_v44 = vmax.f32 %v537_v16, 0.0 }
 0x134   :  { %v543_v29 = vadd.f32 %v542_v27, %v173_v18  ;;  %v678_v35 = vmax.f32 %v539_v39, 0.0  ;;  %v193_v39 = vpop.permute.xlu1 %192 }
 0x135   :  { %v679_v30 = vmax.f32 %v541_v32, 0.0 }
 0x136   :  { %v680_v36 = vmax.f32 %v543_v29, 0.0 }
 0x137   :  { %v2516_v37 = vpack.c.bf16 %v679_v30, %v677_v44 }
 0x138   :  { %v2518_v43 = vpack.c.bf16 %v680_v36, %v678_v35  ;;  %v546_v46 = vpop.f32.mrb[16].mxu0 }
 0x139   :  { %v547_v48 = vadd.f32 %v546_v46, %v178_v41  ;;  %v548_v52 = vpop.f32.mrb[17].mxu0 }
 0x13a   :  { %v549_v56 = vadd.f32 %v548_v52, %v178_v41  ;;  %v550_v57 = vpop.f32.mrb[18].mxu0  ;;  %863 = vmatprep.subr.bf16.mxu1 %v2518_v43  ;;  %1385 = vmatprep.subr.bf16.mxu0 %v2518_v43  ;;  %v198_v41 = vpop.permute.xlu0 %197 }
 0x13b   :  { %v551_v58 = vadd.f32 %v550_v57, %v183_v54  ;;  %v552_v33 = vpop.f32.mrb[19].mxu0  ;;  %864 = vmatpush1.bf16.msra.mxu1 %v2516_v37  ;;  %1386 = vmatpush1.bf16.msra.mxu0 %v2516_v37  ;;  %v681_v62 = vmax.f32 %v547_v48, 0.0 }
 0x13c   :  { %v553_v59 = vadd.f32 %v552_v33, %v183_v54  ;;  %v682_v1 = vmax.f32 %v549_v56, 0.0  ;;  %v203_v56 = vpop.permute.xlu1 %202 }
 0x13d   :  { %v683_v0 = vmax.f32 %v551_v58, 0.0 }
 0x13e   :  { %v684_v3 = vmax.f32 %v553_v59, 0.0 }
 0x13f   :  { %v2529_v4 = vpack.c.bf16 %v683_v0, %v681_v62 }
 0x140   :  { %v2531_v9 = vpack.c.bf16 %v684_v3, %v682_v1  ;;  %v556_v16 = vpop.f32.mrb[20].mxu0  ;;  %v213_v2 = vpop.permute.xlu1 %212 }
 0x141   :  { %v557_v17 = vadd.f32 %v556_v16, %v188_v6  ;;  %v558_v18 = vpop.f32.mrb[21].mxu0  ;;  %v208_v16 = vpop.permute.xlu0 %207 }
 0x142   :  { %v559_v19 = vadd.f32 %v558_v18, %v188_v6  ;;  %v560_v32 = vpop.f32.mrb[22].mxu0  ;;  %865 = vmatprep.subr.bf16.mxu1 %v2531_v9  ;;  %1387 = vmatprep.subr.bf16.mxu0 %v2531_v9 }
 0x143   :  { %v561_v27 = vadd.f32 %v560_v32, %v193_v39  ;;  %v562_v29 = vpop.f32.mrb[23].mxu0  ;;  %866 = vmatpush1.bf16.msra.mxu1 %v2529_v4  ;;  %1388 = vmatpush1.bf16.msra.mxu0 %v2529_v4  ;;  %v685_v44 = vmax.f32 %v557_v17, 0.0 }
 0x144   :  { %v563_v53 = vadd.f32 %v562_v29, %v193_v39  ;;  %v686_v34 = vmax.f32 %v559_v19, 0.0 }
 0x145   :  { %v687_v30 = vmax.f32 %v561_v27, 0.0 }
 0x146   :  { %v688_v35 = vmax.f32 %v563_v53, 0.0 }
 0x147   :  { %v2540_v36 = vpack.c.bf16 %v687_v30, %v685_v44 }
 0x148   :  { %v2542_v46 = vpack.c.bf16 %v688_v35, %v686_v34  ;;  %v566_v48 = vpop.f32.mrb[24].mxu0 }
 0x149   :  { %v567_v52 = vadd.f32 %v566_v48, %v198_v41  ;;  %v568_v54 = vpop.f32.mrb[25].mxu0 }
 0x14a   :  { %v569_v57 = vadd.f32 %v568_v54, %v198_v41  ;;  %v570_v58 = vpop.f32.mrb[26].mxu0  ;;  %867 = vmatprep.subr.bf16.mxu1 %v2542_v46  ;;  %1389 = vmatprep.subr.bf16.mxu0 %v2542_v46  ;;  %v218_v41 = vpop.permute.xlu0 %217 }
 0x14b   :  { %v571_v33 = vadd.f32 %v570_v58, %v203_v56  ;;  %v572_v59 = vpop.f32.mrb[27].mxu0  ;;  %868 = vmatpush1.bf16.msra.mxu1 %v2540_v36  ;;  %1390 = vmatpush1.bf16.msra.mxu0 %v2540_v36  ;;  %v689_v61 = vmax.f32 %v567_v52, 0.0 }
 0x14c   :  { %v573_v62 = vadd.f32 %v572_v59, %v203_v56  ;;  %v690_v1 = vmax.f32 %v569_v57, 0.0  ;;  %v223_v57 = vpop.permute.xlu1 %222 }
 0x14d   :  { %v691_v0 = vmax.f32 %v571_v33, 0.0 }
 0x14e   :  { %v692_v3 = vmax.f32 %v573_v62, 0.0 }
 0x14f   :  { %v2553_v6 = vpack.c.bf16 %v691_v0, %v689_v61 }
 0x150   :  { %v2555_v17 = vpack.c.bf16 %v692_v3, %v690_v1  ;;  %v576_v18 = vpop.f32.mrb[28].mxu0  ;;  %v228_v3 = vpop.permute.xlu0 %227 }
 0x151   :  { %v577_v39 = vadd.f32 %v576_v18, %v208_v16  ;;  %v578_v19 = vpop.f32.mrb[29].mxu0 }
 0x152   :  { %v579_v32 = vadd.f32 %v578_v19, %v208_v16  ;;  %v580_v27 = vpop.f32.mrb[30].mxu0  ;;  %869 = vmatprep.subr.bf16.mxu1 %v2555_v17  ;;  %1391 = vmatprep.subr.bf16.mxu0 %v2555_v17 }
 0x153   :  { %v581_v31 = vadd.f32 %v580_v27, %v213_v2  ;;  %v582_v29 = vpop.f32.mrb[31].mxu0  ;;  %870 = vmatpush1.bf16.msra.mxu1 %v2553_v6  ;;  %1392 = vmatpush1.bf16.msra.mxu0 %v2553_v6  ;;  %v693_v44 = vmax.f32 %v577_v39, 0.0 }
 0x154   :  { %v583_v53 = vadd.f32 %v582_v29, %v213_v2  ;;  %v694_v38 = vmax.f32 %v579_v32, 0.0  ;;  %v233_v2 = vpop.permute.xlu1 %232 }
 0x155   :  { %v695_v30 = vmax.f32 %v581_v31, 0.0 }
 0x156   :  { %v696_v34 = vmax.f32 %v583_v53, 0.0 }
 0x157   :  { %v2566_v35 = vpack.c.bf16 %v695_v30, %v693_v44 }
 0x158   :  { %v2568_v48 = vpack.c.bf16 %v696_v34, %v694_v38  ;;  %v586_v52 = vpop.f32.mrb[32].mxu0  ;;  %v238_v34 = vpop.permute.xlu0 %237 }
 0x159   :  { %v587_v54 = vadd.f32 %v586_v52, %v218_v41  ;;  %v588_v56 = vpop.f32.mrb[33].mxu0 }
 0x15a   :  { %v589_v58 = vadd.f32 %v588_v56, %v218_v41  ;;  %v590_v33 = vpop.f32.mrb[34].mxu0  ;;  %871 = vmatprep.subr.bf16.mxu1 %v2568_v48  ;;  %1393 = vmatprep.subr.bf16.mxu0 %v2568_v48 }
 0x15b   :  { %v591_v42 = vadd.f32 %v590_v33, %v223_v57  ;;  %v592_v55 = vpop.f32.mrb[35].mxu0  ;;  %872 = vmatpush1.bf16.msra.mxu1 %v2566_v35  ;;  %1394 = vmatpush1.bf16.msra.mxu0 %v2566_v35  ;;  %v697_v62 = vmax.f32 %v587_v54, 0.0 }
 0x15c   :  { %v593_v59 = vadd.f32 %v592_v55, %v223_v57  ;;  %v698_v49 = vmax.f32 %v589_v58, 0.0  ;;  %v243_v57 = vpop.permute.xlu1 %242 }
 0x15d   :  { %v699_v61 = vmax.f32 %v591_v42, 0.0 }
 0x15e   :  { %v700_v0 = vmax.f32 %v593_v59, 0.0 }
 0x15f   :  { %v2578_v1 = vpack.c.bf16 %v699_v61, %v697_v62 }
 0x160   :  { %v2580_v16 = vpack.c.bf16 %v700_v0, %v698_v49  ;;  %v596_v18 = vpop.f32.mrb[36].mxu0  ;;  %v248_v49 = vpop.permute.xlu0 %247 }
 0x161   :  { %v597_v39 = vadd.f32 %v596_v18, %v228_v3  ;;  %v598_v19 = vpop.f32.mrb[37].mxu0  ;;  %v1291_v18 = vld [vmem:[%s3106_s3 + $0x80] sm:$0xff] }
 0x162   :  { %v599_v32 = vadd.f32 %v598_v19, %v228_v3  ;;  %v600_v27 = vpop.f32.mrb[38].mxu0  ;;  %873 = vmatprep.subr.bf16.mxu1 %v2580_v16  ;;  %1395 = vmatprep.subr.bf16.mxu0 %v2580_v16 }
 0x163   :  { %v601_v50 = vadd.f32 %v600_v27, %v233_v2  ;;  %v602_v31 = vpop.f32.mrb[39].mxu0  ;;  %874 = vmatpush1.bf16.msra.mxu1 %v2578_v1  ;;  %1396 = vmatpush1.bf16.msra.mxu0 %v2578_v1  ;;  %v701_v53 = vmax.f32 %v597_v39, 0.0 }
 0x164   :  { %v603_v29 = vadd.f32 %v602_v31, %v233_v2  ;;  %v702_v60 = vmax.f32 %v599_v32, 0.0  ;;  %1301 = vperm.xlu0 %1969, %v1291_v18   ;;  %v253_v2 = vpop.permute.xlu1 %252  ;;  %1469 = vperm.xlu1 %1963, %v1291_v18  }
 0x165   :  { %v703_v44 = vmax.f32 %v601_v50, 0.0 }
 0x166   :  { %v704_v30 = vmax.f32 %v603_v29, 0.0 }
 0x167   :  { %v2591_v38 = vpack.c.bf16 %v703_v44, %v701_v53 }
 0x168   :  { %v2593_v41 = vpack.c.bf16 %v704_v30, %v702_v60  ;;  %v606_v52 = vpop.f32.mrb[40].mxu0  ;;  %1316 = vperm.xlu0 %1969, %v2328_v13   ;;  %1964 = vset.pattern.permute.xlu1 %v2061_v51 }
 0x169   :  { %v607_v54 = vadd.f32 %v606_v52, %v238_v34  ;;  %v608_v56 = vpop.f32.mrb[41].mxu0  ;;  %v258_v52 = vpop.permute.xlu0 %257  ;;  %1561 = vperm.xlu1 %1964, %v2366_v22  }
 0x16a   :  { %v609_v58 = vadd.f32 %v608_v56, %v238_v34  ;;  %v610_v33 = vpop.f32.mrb[42].mxu0  ;;  %875 = vmatprep.subr.bf16.mxu1 %v2593_v41  ;;  %1397 = vmatprep.subr.bf16.mxu0 %v2593_v41 }
 0x16b   :  { %v611_v63 = vadd.f32 %v610_v33, %v243_v57  ;;  %v612_v42 = vpop.f32.mrb[43].mxu0  ;;  %876 = vmatpush1.bf16.msra.mxu1 %v2591_v38  ;;  %1398 = vmatpush1.bf16.msra.mxu0 %v2591_v38  ;;  %v705_v55 = vmax.f32 %v607_v54, 0.0  ;;  %v263_v33 = vpop.permute.xlu1 %262 }
 0x16c   :  { %v613_v10 = vadd.f32 %v612_v42, %v243_v57  ;;  %v706_v62 = vmax.f32 %v609_v58, 0.0 }
 0x16d   :  { %v707_v59 = vmax.f32 %v611_v63, 0.0  ;;  %v268_v18 = vpop.permute.xlu0 %267  ;;  %1965 = vset.pattern.permute.xlu1 %v2062_v40 }
 0x16e   :  { %v708_v7 = vmax.f32 %v613_v10, 0.0  ;;  %1477 = vperm.xlu1 %1965, %v2320_v11  }
 0x16f   :  { %v2601_v61 = vpack.c.bf16 %v707_v59, %v705_v55 }
 0x170   :  { %v2603_v0 = vpack.c.bf16 %v708_v7, %v706_v62  ;;  %v616_v3 = vpop.f32.mrb[44].mxu0 }
 0x171   :  { %v617_v39 = vadd.f32 %v616_v3, %v248_v49  ;;  %v618_v19 = vpop.f32.mrb[45].mxu0 }
 0x172   :  { %v619_v32 = vadd.f32 %v618_v19, %v248_v49  ;;  %v620_v27 = vpop.f32.mrb[46].mxu0  ;;  %877 = vmatprep.subr.bf16.mxu1 %v2603_v0  ;;  %1399 = vmatprep.subr.bf16.mxu0 %v2603_v0 }
 0x173   :  { %v621_v50 = vadd.f32 %v620_v27, %v253_v2  ;;  %v622_v31 = vpop.f32.mrb[47].mxu0  ;;  %878 = vmatpush1.bf16.msra.mxu1 %v2601_v61  ;;  %1400 = vmatpush1.bf16.msra.mxu0 %v2601_v61  ;;  %v709_v53 = vmax.f32 %v617_v39, 0.0  ;;  %v273_v27 = vpop.permute.xlu1 %272 }
 0x174   :  { %v623_v29 = vadd.f32 %v622_v31, %v253_v2  ;;  %v710_v60 = vmax.f32 %v619_v32, 0.0  ;;  %1714 = vperm.xlu1 %1965, %v2354_v20  }
 0x175   :  { %v711_v44 = vmax.f32 %v621_v50, 0.0 }
 0x176   :  { %v712_v30 = vmax.f32 %v623_v29, 0.0 }
 0x177   :  { %v2615_v34 = vpack.c.bf16 %v711_v44, %v709_v53 }
 0x178   :  { %v2617_v54 = vpack.c.bf16 %v712_v30, %v710_v60  ;;  %v626_v56 = vpop.f32.mrb[48].mxu0  ;;  %1718 = vperm.xlu1 %1965, %v2360_v21  }
 0x179   :  { %v627_v57 = vadd.f32 %v626_v56, %v258_v52  ;;  %v628_v58 = vpop.f32.mrb[49].mxu0 }
 0x17a   :  { %v629_v63 = vadd.f32 %v628_v58, %v258_v52  ;;  %v630_v42 = vpop.f32.mrb[50].mxu0  ;;  %879 = vmatprep.subr.bf16.mxu1 %v2617_v54  ;;  %1401 = vmatprep.subr.bf16.mxu0 %v2617_v54  ;;  %v278_v58 = vpop.permute.xlu0 %277 }
 0x17b   :  { %v631_v13 = vadd.f32 %v630_v42, %v263_v33  ;;  %v632_v10 = vpop.f32.mrb[51].mxu0  ;;  %880 = vmatpush1.bf16.msra.mxu1 %v2615_v34  ;;  %1402 = vmatpush1.bf16.msra.mxu0 %v2615_v34  ;;  %v713_v59 = vmax.f32 %v627_v57, 0.0 }
 0x17c   :  { %v633_v55 = vadd.f32 %v632_v10, %v263_v33  ;;  %v714_v7 = vmax.f32 %v629_v63, 0.0  ;;  %v283_v10 = vpop.permute.xlu1 %282  ;;  %1966 = vset.pattern.permute.xlu1 %v2061_v51 }
 0x17d   :  { %v715_v62 = vmax.f32 %v631_v13, 0.0  ;;  %1569 = vperm.xlu1 %1966, %v2382_v24  }
 0x17e   :  { %v716_v49 = vmax.f32 %v633_v55, 0.0 }
 0x17f   :  { %v2626_v3 = vpack.c.bf16 %v715_v62, %v713_v59 }
 0x180   :  { %v2628_v39 = vpack.c.bf16 %v716_v49, %v714_v7  ;;  %v636_v19 = vpop.f32.mrb[52].mxu0 }
 0x181   :  { %v637_v2 = vadd.f32 %v636_v19, %v268_v18  ;;  %v638_v32 = vpop.f32.mrb[53].mxu0  ;;  %1967 = vset.pattern.permute.xlu1 %v2062_v40 }
 0x182   :  { %v639_v50 = vadd.f32 %v638_v32, %v268_v18  ;;  %v640_v31 = vpop.f32.mrb[54].mxu0  ;;  %881 = vmatprep.subr.bf16.mxu1 %v2628_v39  ;;  %1403 = vmatprep.subr.bf16.mxu0 %v2628_v39  ;;  %v288_v32 = vpop.permute.xlu0 %287 }
 0x183   :  { %v641_v29 = vadd.f32 %v640_v31, %v273_v27  ;;  %v642_v53 = vpop.f32.mrb[55].mxu0  ;;  %882 = vmatpush1.bf16.msra.mxu1 %v2626_v3  ;;  %1404 = vmatpush1.bf16.msra.mxu0 %v2626_v3  ;;  %v717_v60 = vmax.f32 %v637_v2, 0.0  ;;  %v2653_v31 = vld [vmem:[%s3106_s3 + $0xa8] sm:$0xff] }
 0x184   :  { %v643_v44 = vadd.f32 %v642_v53, %v273_v27  ;;  %v718_v52 = vmax.f32 %v639_v50, 0.0  ;;  %1326 = vperm.xlu0 %1969, %v2653_v31   ;;  %1722 = vperm.xlu1 %1967, %v2366_v22   ;;  %v1991_v22 = vld [vmem:[%s3105_s2 + $0x14] ss:$8 sps:$4 sm:$0xff]  }
 0x185   :  { %v719_v30 = vmax.f32 %v641_v29, 0.0 }
 0x186   :  { %v720_v56 = vmax.f32 %v643_v44, 0.0  ;;  %v293_v44 = vpop.permute.xlu1 %292 }
 0x187   :  { %v2636_v57 = vpack.c.bf16 %v719_v30, %v717_v60 }
 0x188   :  { %v2638_v33 = vpack.c.bf16 %v720_v56, %v718_v52  ;;  %v646_v63 = vpop.f32.mrb[56].mxu0  ;;  %1557 = vperm.xlu0 %1969, %v2360_v21   ;;  %v1988_v21 = vld [vmem:[%s3105_s2] ss:$8 sps:$4 sm:$0xff]   ;;  %1485 = vperm.xlu1 %1967, %v2333_v14   ;;  %v2005_v14 = vld [vmem:[%s3105_s2 + $0x90] ss:$8 sps:$4 sm:$0xff]  }
 0x189   :  { %v647_v42 = vadd.f32 %v646_v63, %v278_v58  ;;  %v648_v13 = vpop.f32.mrb[57].mxu0 }
 0x18a   :  { %v649_v55 = vadd.f32 %v648_v13, %v278_v58  ;;  %v650_v59 = vpop.f32.mrb[58].mxu0  ;;  %883 = vmatprep.subr.bf16.mxu1 %v2638_v33  ;;  %1405 = vmatprep.subr.bf16.mxu0 %v2638_v33 }
 0x18b   :  { %v651_v11 = vadd.f32 %v650_v59, %v283_v10  ;;  %v652_v62 = vpop.f32.mrb[59].mxu0  ;;  %884 = vmatpush1.bf16.msra.mxu1 %v2636_v57  ;;  %1406 = vmatpush1.bf16.msra.mxu0 %v2636_v57  ;;  %v721_v49 = vmax.f32 %v647_v42, 0.0 }
 0x18c   :  { %v653_v7 = vadd.f32 %v652_v62, %v283_v10  ;;  %v722_v19 = vmax.f32 %v649_v55, 0.0  ;;  %1565 = vperm.xlu0 %1969, %v2375_v23   ;;  %v2003_v23 = vld [vmem:[%s3105_s2 + $0x94] ss:$8 sps:$4 sm:$0xff]   ;;  %1968 = vset.pattern.permute.xlu1 %v2061_v51  ;;  %v2006_v51 = vld [vmem:[%s3105_s2 + $0xa4] ss:$8 sps:$4 sm:$0xff]  }
 0x18d   :  { %v723_v18 = vmax.f32 %v651_v11, 0.0  ;;  %v2000_v11 = vld [vmem:[%s3105_s2 + $0x80] ss:$8 sps:$4 sm:$0xff]   ;;  %v1297_v62 = vld [vmem:[%s3106_s3 + $0xb0] sm:$0xff]  ;;  %1573 = vperm.xlu1 %1968, %v2389_v25  }
 0x18e   :  { %v724_v20 = vmax.f32 %v653_v7, 0.0  ;;  %v1993_v7 = vld [vmem:[%s3105_s2 + $0x10] ss:$8 sps:$4 sm:$0xff]  }
 0x18f   :  { %v2646_v2 = vpack.c.bf16 %v723_v18, %v721_v49  ;;  %v1994_v49 = vld [vmem:[%s3105_s2 + $0x24] ss:$8 sps:$4 sm:$0xff]   ;;  %v1298_v18 = vld [vmem:[%s3106_s3 + $0xb8] sm:$0xff] }
 0x190   :  { %v2648_v27 = vpack.c.bf16 %v724_v20, %v722_v19  ;;  %v656_v50 = vpop.f32.mrb[60].mxu0  ;;  %1331 = vperm.xlu0 %1969, %v1297_v62   ;;  %v1996_v19 = vld [vmem:[%s3105_s2 + $0x20] ss:$8 sps:$4 sm:$0xff]  }
 0x191   :  { %v657_v29 = vadd.f32 %v656_v50, %v288_v32  ;;  %v658_v53 = vpop.f32.mrb[61].mxu0  ;;  %1336 = vperm.xlu1 %1968, %v1298_v18   ;;  %v2008_v20 = vld [vmem:[%s3105_s2 + $0xa0] ss:$8 sps:$4 sm:$0xff]   ;;  %v2009_v50 = vld [vmem:[%s3105_s2 + $0xb4] ss:$8 sps:$4 sm:$0xff]  }
 0x192   :  { %v659_v60 = vadd.f32 %v658_v53, %v288_v32  ;;  %v660_v30 = vpop.f32.mrb[62].mxu0  ;;  %885 = vmatprep.subr.bf16.mxu1 %v2648_v27  ;;  %1407 = vmatprep.subr.bf16.mxu0 %v2648_v27  ;;  %v1997_v32 = vld [vmem:[%s3105_s2 + $0x34] ss:$8 sps:$4 sm:$0xff]   ;;  %v2011_v53 = vld [vmem:[%s3105_s2 + $0xb0] ss:$8 sps:$4 sm:$0xff]  }
 0x193   :  { %v661_v52 = vadd.f32 %v660_v30, %v293_v44  ;;  %v662_v56 = vpop.f32.mrb[63].mxu0  ;;  %886 = vmatpush1.bf16.msra.mxu1 %v2646_v2  ;;  %1408 = vmatpush1.bf16.msra.mxu0 %v2646_v2  ;;  %v725_v63 = vmax.f32 %v657_v29, 0.0  ;;  %v1999_v29 = vld [vmem:[%s3105_s2 + $0x30] ss:$8 sps:$4 sm:$0xff]  }
 0x194   :  { %v663_v58 = vadd.f32 %v662_v56, %v293_v44  ;;  %v726_v13 = vmax.f32 %v659_v60, 0.0  ;;  %1577 = vperm.xlu0 %1969, %v2395_v26  }
 0x195   :  { %v727_v42 = vmax.f32 %v661_v52, 0.0  ;;  %1970 = vset.pattern.permute.xlu1 %v2062_v40  ;;  %v2015_v52 = vld [vmem:[%s3105_s2 + $0x54] ss:$8 sps:$4 sm:$0xff]  }
 0x196   :  { %v728_v10 = vmax.f32 %v663_v58, 0.0  ;;  %1489 = vperm.xlu1 %1970, %v2653_v31   ;;  %v2747_v31 = vpop.permute.xlu1 %784  ;;  %v2017_v58 = vld [vmem:[%s3105_s2 + $0x50] ss:$8 sps:$4 sm:$0xff]  }
 0x197   :  { %v2663_v55 = vpack.c.bf16 %v727_v42, %v725_v63  ;;  %v2018_v63 = vld [vmem:[%s3105_s2 + $0x64] ss:$8 sps:$4 sm:$0xff]   ;;  %v2032_v42 = vld [vmem:[%s3105_s2 + $0xe0] ss:$8 sps:$4 sm:$0xff]  }
 0x198   :  { %v2665_v59 = vpack.c.bf16 %v728_v10, %v726_v13  ;;  %1581 = vperm.xlu0 %1969, %v2404_v28   ;;  %v2033_v13 = vld [vmem:[%s3105_s2 + $0xf4] ss:$8 sps:$4 sm:$0xff]  }
 0x19a   :  { %887 = vmatprep.subr.bf16.mxu1 %v2665_v59  ;;  %1409 = vmatprep.subr.bf16.mxu0 %v2665_v59  ;;  %v2753_v44 = vpop.permute.xlu1 %789 }
 0x19b   :  { %888 = vmatpush1.bf16.msra.mxu1 %v2663_v55  ;;  %1410 = vmatpush1.bf16.msra.mxu0 %v2663_v55 }
 0x19c   :  { %1118 = vmatprep.subr.bf16.mxu1 %v2480_v15  ;;  %1971 = vset.pattern.permute.xlu0 %v2062_v40  ;;  %v2014_v40 = vld [vmem:[%s3105_s2 + $0x44] ss:$8 sps:$4 sm:$0xff]  }
 0x19d   :  { %1497 = vperm.xlu0 %1971, %v1298_v18   ;;  %1730 = vperm.xlu1 %1970, %v2382_v24  }
 0x19e   :  { %890 = vmatmul.mubr.bf16.vlgmr.msra.gmra.mrb[0].mxu1 %v1988_v21  ;;  %1412 = vmatmul.mubr.bf16.vlgmr.msra.gmra.mrb[64].mxu0 %v2000_v11  ;;  %v2759_v24 = vpop.permute.xlu1 %799 }
 0x19f   :  { %1119 = vmatpush1.bf16.msra.mxu1 %v2478_v12  ;;  %899 = vmatprep.mubr.bf16.mxu1 %v1991_v22 }
 0x1a0   :  { %1120 = vmatprep.subr.bf16.mxu1 %v2491_v47  ;;  %1421 = vmatprep.mubr.bf16.mxu0 %v2003_v23 }
 0x1a1   :  { %1493 = vperm.xlu1 %1970, %v1297_v62  }
 0x1a2   :  { %v2766_v60 = vpop.permute.xlu1 %809 }
 0x1a3   :  { %1121 = vmatpush1.bf16.msra.mxu1 %v2489_v45 }
 0x1a4   :  { %1122 = vmatprep.subr.bf16.mxu1 %v2503_v8 }
 0x1a5   :  { %1734 = vperm.xlu1 %1970, %v2389_v25  }
 0x1a6   :  { %900 = vmatmul.mubr.bf16.gmra.mrb[4].mxu1 %v1993_v7  ;;  %1422 = vmatmul.mubr.bf16.gmra.mrb[68].mxu0 %v2005_v14  ;;  %v2770_v25 = vpop.permute.xlu1 %947 }
 0x1a7   :  { %1123 = vmatpush1.bf16.msra.mxu1 %v2501_v5  ;;  %909 = vmatprep.mubr.bf16.mxu1 %v1994_v49 }
 0x1a8   :  { %1124 = vmatprep.subr.bf16.mxu1 %v2518_v43  ;;  %1431 = vmatprep.mubr.bf16.mxu0 %v2006_v51 }
 0x1a9   :  { %1738 = vperm.xlu1 %1970, %v2395_v26  }
 0x1aa   :  { %v2776_v26 = vpop.permute.xlu1 %955 }
 0x1ab   :  { %1125 = vmatpush1.bf16.msra.mxu1 %v2516_v37 }
 0x1ac   :  { %1126 = vmatprep.subr.bf16.mxu1 %v2531_v9 }
 0x1ad   :  { %1742 = vperm.xlu1 %1970, %v2404_v28   ;;  %v2012_v28 = vld [vmem:[%s3105_s2 + $0x40] ss:$8 sps:$4 sm:$0xff]  }
 0x1ae   :  { %910 = vmatmul.mubr.bf16.gmra.mrb[8].mxu1 %v1996_v19  ;;  %1432 = vmatmul.mubr.bf16.gmra.mrb[72].mxu0 %v2008_v20  ;;  %v2783_v30 = vpop.permute.xlu1 %959 }
 0x1af   :  { %1127 = vmatpush1.bf16.msra.mxu1 %v2529_v4  ;;  %919 = vmatprep.mubr.bf16.mxu1 %v1997_v32 }
 0x1b0   :  { %1128 = vmatprep.subr.bf16.mxu1 %v2542_v46  ;;  %1441 = vmatprep.mubr.bf16.mxu0 %v2009_v50 }
 0x1b2   :  { %v2792_v56 = vpop.permute.xlu1 %967 }
 0x1b3   :  { %1129 = vmatpush1.bf16.msra.mxu1 %v2540_v36 }
 0x1b4   :  { %1130 = vmatprep.subr.bf16.mxu1 %v2555_v17 }
 0x1b6   :  { %920 = vmatmul.mubr.bf16.gmra.mrb[12].mxu1 %v1999_v29  ;;  %1442 = vmatmul.mubr.bf16.gmra.mrb[76].mxu0 %v2011_v53 }
 0x1b7   :  { %1131 = vmatpush1.bf16.msra.mxu1 %v2553_v6  ;;  %1150 = vmatprep.mubr.bf16.mxu1 %v2014_v40 }
 0x1b8   :  { %1132 = vmatprep.subr.bf16.mxu1 %v2568_v48 }
 0x1bb   :  { %1133 = vmatpush1.bf16.msra.mxu1 %v2566_v35 }
 0x1bc   :  { %1134 = vmatprep.subr.bf16.mxu1 %v2580_v16 }
 0x1bf   :  { %1135 = vmatpush1.bf16.msra.mxu1 %v2578_v1 }
 0x1c0   :  { %1136 = vmatprep.subr.bf16.mxu1 %v2593_v41 }
 0x1c3   :  { %1137 = vmatpush1.bf16.msra.mxu1 %v2591_v38 }
 0x1c4   :  { %1138 = vmatprep.subr.bf16.mxu1 %v2603_v0 }
 0x1c7   :  { %1139 = vmatpush1.bf16.msra.mxu1 %v2601_v61 }
 0x1c8   :  { %1140 = vmatprep.subr.bf16.mxu1 %v2617_v54 }
 0x1cb   :  { %1141 = vmatpush1.bf16.msra.mxu1 %v2615_v34 }
 0x1cc   :  { %1142 = vmatprep.subr.bf16.mxu1 %v2628_v39 }
 0x1cf   :  { %1143 = vmatpush1.bf16.msra.mxu1 %v2626_v3 }
 0x1d0   :  { %1144 = vmatprep.subr.bf16.mxu1 %v2638_v33 }
 0x1d3   :  { %1145 = vmatpush1.bf16.msra.mxu1 %v2636_v57 }
 0x1d4   :  { %1146 = vmatprep.subr.bf16.mxu1 %v2648_v27 }
 0x1d7   :  { %1147 = vmatpush1.bf16.msra.mxu1 %v2646_v2 }
 0x1d8   :  { %1148 = vmatprep.subr.bf16.mxu1 %v2665_v59 }
 0x1db   :  { %1149 = vmatpush1.bf16.msra.mxu1 %v2663_v55 }
 0x1dc   :  { %1624 = vmatprep.subr.bf16.mxu1 %v2480_v15  ;;  %v2802_v15 = vpop.permute.xlu1 %975 }
 0x1de   :  { %1151 = vmatmul.mubr.bf16.vlgmr.msra.gmra.mrb[16].mxu1 %v2012_v28 }
 0x1df   :  { %1625 = vmatpush1.bf16.msra.mxu1 %v2478_v12  ;;  %1160 = vmatprep.mubr.bf16.mxu1 %v2015_v52  ;;  %v2020_v12 = vld [vmem:[%s3105_s2 + $0x60] ss:$8 sps:$4 sm:$0xff]  }
 0x1e0   :  { %1626 = vmatprep.subr.bf16.mxu1 %v2491_v47  ;;  %v2814_v47 = vpop.permute.xlu1 %1045 }
 0x1e3   :  { %1627 = vmatpush1.bf16.msra.mxu1 %v2489_v45  ;;  %v2021_v45 = vld [vmem:[%s3105_s2 + $0x74] ss:$8 sps:$4 sm:$0xff]  }
 0x1e4   :  { %1628 = vmatprep.subr.bf16.mxu1 %v2503_v8  ;;  %v2821_v8 = vpop.permute.xlu0 %951 }
 0x1e6   :  { %1161 = vmatmul.mubr.bf16.gmra.mrb[20].mxu1 %v2017_v58 }
 0x1e7   :  { %1629 = vmatpush1.bf16.msra.mxu1 %v2501_v5  ;;  %1170 = vmatprep.mubr.bf16.mxu1 %v2018_v63  ;;  %v2023_v5 = vld [vmem:[%s3105_s2 + $0x70] ss:$8 sps:$4 sm:$0xff]  }
 0x1e8   :  { %1630 = vmatprep.subr.bf16.mxu1 %v2518_v43  ;;  %v2026_v43 = vld [vmem:[%s3105_s2 + $0xc4] ss:$8 sps:$4 sm:$0xff]  }
 0x1eb   :  { %1631 = vmatpush1.bf16.msra.mxu1 %v2516_v37  ;;  %v2823_v37 = vpop.permute.xlu1 %1050 }
 0x1ec   :  { %1632 = vmatprep.subr.bf16.mxu1 %v2531_v9 }
 0x1ee   :  { %1171 = vmatmul.mubr.bf16.gmra.mrb[24].mxu1 %v2020_v12 }
 0x1ef   :  { %1633 = vmatpush1.bf16.msra.mxu1 %v2529_v4  ;;  %1180 = vmatprep.mubr.bf16.mxu1 %v2021_v45  ;;  %v2832_v4 = vpop.permute.xlu0 %963  ;;  %v2834_v9 = vpop.permute.xlu1 %1060 }
 0x1f0   :  { %1634 = vmatprep.subr.bf16.mxu1 %v2542_v46 }
 0x1f3   :  { %1635 = vmatpush1.bf16.msra.mxu1 %v2540_v36  ;;  %v2838_v36 = vpop.permute.xlu0 %971  ;;  %v2840_v46 = vpop.permute.xlu1 %1070 }
 0x1f4   :  { %1636 = vmatprep.subr.bf16.mxu1 %v2555_v17 }
 0x1f6   :  { %1181 = vmatmul.mubr.bf16.gmra.mrb[28].mxu1 %v2023_v5 }
 0x1f7   :  { %1637 = vmatpush1.bf16.msra.mxu1 %v2553_v6  ;;  %1656 = vmatprep.mubr.bf16.mxu1 %v2026_v43  ;;  %v2846_v6 = vpop.permute.xlu0 %1212  ;;  %v2848_v17 = vpop.permute.xlu1 %1208 }
 0x1f8   :  { %1638 = vmatprep.subr.bf16.mxu1 %v2568_v48 }
 0x1fb   :  { %1639 = vmatpush1.bf16.msra.mxu1 %v2566_v35  ;;  %v2852_v35 = vpop.permute.xlu0 %1224  ;;  %v2854_v48 = vpop.permute.xlu1 %1216 }
 0x1fc   :  { %1640 = vmatprep.subr.bf16.mxu1 %v2580_v16 }
 0x1ff   :  { %1641 = vmatpush1.bf16.msra.mxu1 %v2578_v1  ;;  %v2860_v1 = vpop.permute.xlu0 %1232  ;;  %v2862_v16 = vpop.permute.xlu1 %1220 }
 0x200   :  { %1642 = vmatprep.subr.bf16.mxu1 %v2593_v41 }
 0x203   :  { %1643 = vmatpush1.bf16.msra.mxu1 %v2591_v38  ;;  %v2866_v38 = vpop.permute.xlu0 %1473  ;;  %v2868_v41 = vpop.permute.xlu1 %1228 }
 0x204   :  { %1644 = vmatprep.subr.bf16.mxu1 %v2603_v0  ;;  %v2027_v0 = vld [vmem:[%s3105_s2 + $0xd4] ss:$8 sps:$4 sm:$0xff]  }
 0x207   :  { %1645 = vmatpush1.bf16.msra.mxu1 %v2601_v61  ;;  %v2024_v61 = vld [vmem:[%s3105_s2 + $0xc0] ss:$8 sps:$4 sm:$0xff]  }
 0x208   :  { %1646 = vmatprep.subr.bf16.mxu1 %v2617_v54  ;;  %v2881_v54 = vpop.permute.xlu1 %1236 }
 0x209   :  { %3120 = vst [vmem:[#allocation6_spill] sm:$0xff] %v2881_v54 }
 0x20b   :  { %1647 = vmatpush1.bf16.msra.mxu1 %v2615_v34  ;;  %v2879_v34 = vpop.permute.xlu0 %1481 }
 0x20c   :  { %1648 = vmatprep.subr.bf16.mxu1 %v2628_v39 }
 0x20f   :  { %1649 = vmatpush1.bf16.msra.mxu1 %v2626_v3  ;;  %v2029_v3 = vld [vmem:[%s3105_s2 + $0xd0] ss:$8 sps:$4 sm:$0xff]   ;;  %v2886_v39 = vpop.permute.xlu0 %1726 }
 0x210   :  { %1650 = vmatprep.subr.bf16.mxu1 %v2638_v33  ;;  %3121 = vst [vmem:[#allocation7_spill] sm:$0xff] %v2886_v39  ;;  %v2030_v33 = vld [vmem:[%s3105_s2 + $0xe4] ss:$8 sps:$4 sm:$0xff]  }
 0x213   :  { %1651 = vmatpush1.bf16.msra.mxu1 %v2636_v57  ;;  %v1307_v57 = vpop.permute.xlu1 %1306 }
 0x214   :  { %1652 = vmatprep.subr.bf16.mxu1 %v2648_v27 }
 0x217   :  { %1653 = vmatpush1.bf16.msra.mxu1 %v2646_v2  ;;  %v780_v2 = vpop.permute.xlu0 %779  ;;  %v2891_v27 = vpop.permute.xlu1 %1311 }
 0x218   :  { %1654 = vmatprep.subr.bf16.mxu1 %v2665_v59  ;;  %v2035_v59 = vld [vmem:[%s3105_s2 + $0xf0] ss:$8 sps:$4 sm:$0xff]  }
 0x21b   :  { %1655 = vmatpush1.bf16.msra.mxu1 %v2663_v55  ;;  %v2899_v10 = vpop.permute.xlu0 %794  ;;  %v2901_v55 = vpop.permute.xlu1 %1321 }
 0x21e   :  { %1657 = vmatmul.mubr.bf16.vlgmr.msra.gmra.mrb[32].mxu1 %v2024_v61 }
 0x21f   :  { %1666 = vmatprep.mubr.bf16.mxu1 %v2027_v0  ;;  %v2906_v21 = vpop.permute.xlu0 %804  ;;  %v2908_v11 = vpop.permute.xlu1 %1553 }
 0x220   :  { %3122 = vst [vmem:[#allocation8_spill] sm:$0xff] %v2908_v11 }
 0x223   :  { %v2910_v22 = vpop.permute.xlu0 %814  ;;  %v1470_v23 = vpop.permute.xlu1 %1469 }
 0x226   :  { %1667 = vmatmul.mubr.bf16.gmra.mrb[36].mxu1 %v2029_v3 }
 0x227   :  { %1676 = vmatprep.mubr.bf16.mxu1 %v2030_v33  ;;  %v2912_v62 = vpop.permute.xlu0 %1040  ;;  %v2914_v7 = vpop.permute.xlu1 %1561 }
 0x228   :  { %3123 = vst [vmem:[#allocation9_spill] sm:$0xff] %v2914_v7 }
 0x22b   :  { %v2916_v14 = vpop.permute.xlu0 %1055  ;;  %v2918_v49 = vpop.permute.xlu1 %1477 }
 0x22e   :  { %1677 = vmatmul.mubr.bf16.gmra.mrb[40].mxu1 %v2032_v42 }
 0x22f   :  { %1686 = vmatprep.mubr.bf16.mxu1 %v2033_v13  ;;  %v2920_v51 = vpop.permute.xlu0 %1065  ;;  %v2922_v18 = vpop.permute.xlu1 %1714 }
 0x230   :  { %3124 = vst [vmem:[#allocation10_spill] sm:$0xff] %v2922_v18 }
 0x233   :  { %v2924_v19 = vpop.permute.xlu0 %1075  ;;  %v2926_v20 = vpop.permute.xlu1 %1718 }
 0x234   :  { %3125 = vst [vmem:[#allocation11_spill] sm:$0xff] %v2926_v20 }
 0x236   :  { %1687 = vmatmul.mubr.bf16.gmra.mrb[44].mxu1 %v2035_v59 }
 0x237   :  { %v1302_v32 = vpop.permute.xlu0 %1301  ;;  %v2928_v50 = vpop.permute.xlu1 %1569 }
 0x238   :  { %3126 = vst [vmem:[#allocation12_spill] sm:$0xff] %v2928_v50 }
 0x23b   :  { %v2930_v29 = vpop.permute.xlu0 %1316  ;;  %v2932_v53 = vpop.permute.xlu1 %1722 }
 0x23c   :  { %3127 = vst [vmem:[#allocation13_spill] sm:$0xff] %v2932_v53 }
 0x23f   :  { %v2934_v40 = vpop.permute.xlu0 %1326  ;;  %v2936_v28 = vpop.permute.xlu1 %1485 }
 0x243   :  { %v2938_v52 = vpop.permute.xlu0 %1557  ;;  %v2940_v58 = vpop.permute.xlu1 %1573 }
 0x244   :  { %3128 = vst [vmem:[#allocation14_spill] sm:$0xff] %v2938_v52  ;;  %3129 = vst [vmem:[#allocation15_spill] sm:$0xff] %v2940_v58 }
 0x247   :  { %v2942_v63 = vpop.permute.xlu0 %1565  ;;  %v2944_v12 = vpop.permute.xlu1 %1336 }
 0x248   :  { %3130 = vst [vmem:[#allocation16_spill] sm:$0xff] %v2942_v63 }
 0x271   :  { %v891_v45 = vpop.f32.mrb[0].mxu1  ;;  %v1413_v5 = vpop.f32.mrb[64].mxu0 }
 0x272   :  { %v892_v43 = vadd.f32 %v891_v45, %v780_v2  ;;  %v893_v61 = vpop.f32.mrb[1].mxu1  ;;  %v1414_v0 = vadd.f32 %v1413_v5, %v1302_v32  ;;  %v1415_v3 = vpop.f32.mrb[65].mxu0 }
 0x273   :  { %v894_v33 = vadd.f32 %v893_v61, %v780_v2  ;;  %v895_v42 = vpop.f32.mrb[2].mxu1  ;;  %v1416_v13 = vadd.f32 %v1415_v3, %v1302_v32  ;;  %v1417_v59 = vpop.f32.mrb[66].mxu0 }
 0x274   :  { %v930_v50 = vmax.f32 %v892_v43, 0.0  ;;  %v896_v39 = vadd.f32 %v895_v42, %v2747_v31  ;;  %v897_v53 = vpop.f32.mrb[3].mxu1  ;;  %v1452_v7 = vmax.f32 %v1414_v0, 0.0  ;;  %v1418_v58 = vadd.f32 %v1417_v59, %v1307_v57  ;;  %v1419_v20 = vpop.f32.mrb[67].mxu0 }
 0x275   :  { %v931_v63 = vmax.f32 %v894_v33, 0.0  ;;  %v898_v18 = vadd.f32 %v897_v53, %v2747_v31  ;;  %v1453_v52 = vmax.f32 %v1416_v13, 0.0  ;;  %v1420_v11 = vadd.f32 %v1419_v20, %v1307_v57  ;;  %v2951_v0 = vpop.permute.xlu0 %1331  ;;  %v2953_v59 = vpop.permute.xlu1 %1489 }
 0x276   :  { %v978_v45 = vmul.f32 %v2770_v25, %v930_v50  ;;  %v932_v5 = vmax.f32 %v896_v39, 0.0  ;;  %v1500_v54 = vmul.f32 %v1470_v23, %v1452_v7  ;;  %v1454_v2 = vmax.f32 %v1418_v58, 0.0 }
 0x277   :  { %v933_v61 = vmax.f32 %v898_v18, 0.0  ;;  %v1501_v32 = vmul.f32 %v1470_v23, %v1453_v52  ;;  %v1455_v3 = vmax.f32 %v1420_v11, 0.0  ;;  %v979_v31 = vmul.f32 %v2770_v25, %v931_v63 }
 0x278   :  { %v980_v43 = vmul.f32 %v2821_v8, %v932_v5  ;;  %v1502_v42 = vmul.f32 %v2866_v38, %v1454_v2 }
 0x279   :  { %v981_v57 = vmul.f32 %v2821_v8, %v933_v61  ;;  %v901_v20 = vpop.f32.mrb[4].mxu1  ;;  %v1503_v39 = vmul.f32 %v2866_v38, %v1455_v3  ;;  %v1423_v7 = vpop.f32.mrb[68].mxu0 }
 0x27a   :  { %v994_v50 = vadd.f32 %v980_v43, %v978_v45  ;;  %v902_v23 = vadd.f32 %v901_v20, %v2753_v44  ;;  %v903_v11 = vpop.f32.mrb[5].mxu1  ;;  %v1516_v18 = vadd.f32 %v1502_v42, %v1500_v54  ;;  %v1424_v53 = vadd.f32 %v1423_v7, %v2891_v27  ;;  %v1425_v52 = vpop.f32.mrb[69].mxu0 }
 0x27b   :  { %v1007_v58 = vadd.f32 %v981_v57, %v979_v31  ;;  %v904_v33 = vadd.f32 %v903_v11, %v2753_v44  ;;  %v905_v13 = vpop.f32.mrb[6].mxu1  ;;  %v1529_v5 = vadd.f32 %v1503_v39, %v1501_v32  ;;  %v1426_v25 = vadd.f32 %v1425_v52, %v2891_v27  ;;  %v1427_v8 = vpop.f32.mrb[70].mxu0 }
 0x27c   :  { %v934_v63 = vmax.f32 %v902_v23, 0.0  ;;  %v906_v38 = vadd.f32 %v905_v13, %v2899_v10  ;;  %v907_v2 = vpop.f32.mrb[7].mxu1  ;;  %v1456_v45 = vmax.f32 %v1424_v53, 0.0  ;;  %v1428_v61 = vadd.f32 %v1427_v8, %v2930_v29  ;;  %v1429_v3 = vpop.f32.mrb[71].mxu0 }
 0x27d   :  { %v935_v54 = vmax.f32 %v904_v33, 0.0  ;;  %v908_v43 = vadd.f32 %v907_v2, %v2899_v10  ;;  %v1457_v42 = vmax.f32 %v1426_v25, 0.0  ;;  %v1430_v31 = vadd.f32 %v1429_v3, %v2930_v29  ;;  %v2972_v33 = vpop.permute.xlu0 %1577  ;;  %v2974_v29 = vpop.permute.xlu1 %1730 }
 0x27e   :  { %v982_v44 = vmul.f32 %v2776_v26, %v934_v63  ;;  %v936_v32 = vmax.f32 %v906_v38, 0.0  ;;  %v1504_v27 = vmul.f32 %v2918_v49, %v1456_v45  ;;  %v1458_v57 = vmax.f32 %v1428_v61, 0.0 }
 0x27f   :  { %v983_v20 = vmul.f32 %v2776_v26, %v935_v54  ;;  %v937_v39 = vmax.f32 %v908_v43, 0.0  ;;  %v1505_v7 = vmul.f32 %v2918_v49, %v1457_v42  ;;  %v1459_v23 = vmax.f32 %v1430_v31, 0.0 }
 0x280   :  { %v995_v11 = vadd.f32 %v994_v50, %v982_v44  ;;  %v984_v53 = vmul.f32 %v2783_v30, %v936_v32  ;;  %v1517_v52 = vadd.f32 %v1516_v18, %v1504_v27  ;;  %v1506_v10 = vmul.f32 %v2879_v34, %v1458_v57 }
 0x281   :  { %v1008_v13 = vadd.f32 %v1007_v58, %v983_v20  ;;  %v985_v25 = vmul.f32 %v2783_v30, %v937_v39  ;;  %v911_v8 = vpop.f32.mrb[8].mxu1  ;;  %v1530_v63 = vadd.f32 %v1529_v5, %v1505_v7  ;;  %v1507_v26 = vmul.f32 %v2879_v34, %v1459_v23  ;;  %v1433_v38 = vpop.f32.mrb[72].mxu0 }
 0x282   :  { %v996_v49 = vadd.f32 %v995_v11, %v984_v53  ;;  %v912_v50 = vadd.f32 %v911_v8, %v2759_v24  ;;  %v913_v2 = vpop.f32.mrb[9].mxu1  ;;  %v1518_v45 = vadd.f32 %v1517_v52, %v1506_v10  ;;  %v1434_v18 = vadd.f32 %v1433_v38, %v2901_v55  ;;  %v1435_v61 = vpop.f32.mrb[73].mxu0 }
 0x283   :  { %v1009_v3 = vadd.f32 %v1008_v13, %v985_v25  ;;  %v914_v54 = vadd.f32 %v913_v2, %v2759_v24  ;;  %v915_v43 = vpop.f32.mrb[10].mxu1  ;;  %v1531_v58 = vadd.f32 %v1530_v63, %v1507_v26  ;;  %v1436_v30 = vadd.f32 %v1435_v61, %v2901_v55  ;;  %v1437_v42 = vpop.f32.mrb[74].mxu0 }
 0x284   :  { %v938_v5 = vmax.f32 %v912_v50, 0.0  ;;  %v916_v34 = vadd.f32 %v915_v43, %v2906_v21  ;;  %v917_v31 = vpop.f32.mrb[11].mxu1  ;;  %v1460_v44 = vmax.f32 %v1434_v18, 0.0  ;;  %v1438_v32 = vadd.f32 %v1437_v42, %v2934_v40  ;;  %v1439_v27 = vpop.f32.mrb[75].mxu0 }
 0x285   :  { %v939_v57 = vmax.f32 %v914_v54, 0.0  ;;  %v918_v20 = vadd.f32 %v917_v31, %v2906_v21  ;;  %v1461_v39 = vmax.f32 %v1436_v30, 0.0  ;;  %v1440_v7 = vadd.f32 %v1439_v27, %v2934_v40  ;;  %v2990_v25 = vpop.permute.xlu0 %1581  ;;  %v1494_v26 = vpop.permute.xlu1 %1493 }
 0x286   :  { %v986_v24 = vmul.f32 %v2832_v4, %v938_v5  ;;  %v940_v23 = vmax.f32 %v916_v34, 0.0  ;;  %v1508_v55 = vmul.f32 %v2936_v28, %v1460_v44  ;;  %v1462_v11 = vmax.f32 %v1438_v32, 0.0 }
 0x287   :  { %v987_v53 = vmul.f32 %v2832_v4, %v939_v57  ;;  %v941_v52 = vmax.f32 %v918_v20, 0.0  ;;  %v1509_v10 = vmul.f32 %v2936_v28, %v1461_v39  ;;  %v1463_v13 = vmax.f32 %v1440_v7, 0.0 }
 0x288   :  { %v997_v8 = vadd.f32 %v996_v49, %v986_v24  ;;  %v988_v21 = vmul.f32 %v2792_v56, %v940_v23  ;;  %v1519_v63 = vadd.f32 %v1518_v45, %v1508_v55  ;;  %v1510_v40 = vmul.f32 %v2953_v59, %v1462_v11 }
 0x289   :  { %v1010_v38 = vadd.f32 %v1009_v3, %v987_v53  ;;  %v989_v50 = vmul.f32 %v2792_v56, %v941_v52  ;;  %v921_v2 = vpop.f32.mrb[12].mxu1  ;;  %v1532_v18 = vadd.f32 %v1531_v58, %v1509_v10  ;;  %v1511_v4 = vmul.f32 %v2953_v59, %v1463_v13  ;;  %v1443_v61 = vpop.f32.mrb[76].mxu0 }
 0x28a   :  { %v998_v54 = vadd.f32 %v997_v8, %v988_v21  ;;  %v922_v28 = vadd.f32 %v921_v2, %v2766_v60  ;;  %v923_v43 = vpop.f32.mrb[13].mxu1  ;;  %v1520_v30 = vadd.f32 %v1519_v63, %v1510_v40  ;;  %v1444_v49 = vadd.f32 %v1443_v61, %v2951_v0  ;;  %v1445_v42 = vpop.f32.mrb[77].mxu0 }
 0x28b   :  { %v1011_v45 = vadd.f32 %v1010_v38, %v989_v50  ;;  %v924_v5 = vadd.f32 %v923_v43, %v2766_v60  ;;  %v925_v34 = vpop.f32.mrb[14].mxu1  ;;  %v1533_v3 = vadd.f32 %v1532_v18, %v1511_v4  ;;  %v1446_v56 = vadd.f32 %v1445_v42, %v2951_v0  ;;  %v1447_v31 = vpop.f32.mrb[78].mxu0 }
 0x28c   :  { %v942_v58 = vmax.f32 %v922_v28, 0.0  ;;  %v926_v59 = vadd.f32 %v925_v34, %v2910_v22  ;;  %v927_v44 = vpop.f32.mrb[15].mxu1  ;;  %v1464_v32 = vmax.f32 %v1444_v49, 0.0  ;;  %v1448_v27 = vadd.f32 %v1447_v31, %v2944_v12  ;;  %v1449_v57 = vpop.f32.mrb[79].mxu0 }
 0x28d   :  { %v943_v20 = vmax.f32 %v924_v5, 0.0  ;;  %v928_v39 = vadd.f32 %v927_v44, %v2910_v22  ;;  %v1465_v7 = vmax.f32 %v1446_v56, 0.0  ;;  %v1450_v24 = vadd.f32 %v1449_v57, %v2944_v12  ;;  %v1498_v60 = vpop.permute.xlu0 %1497 }
 0x28e   :  { %v990_v23 = vmul.f32 %v2838_v36, %v942_v58  ;;  %v944_v55 = vmax.f32 %v926_v59, 0.0  ;;  %v1466_v0 = vmax.f32 %v1448_v27, 0.0  ;;  %v1512_v11 = vmul.f32 %v1494_v26, %v1464_v32 }
 0x28f   :  { %v991_v53 = vmul.f32 %v2838_v36, %v943_v20  ;;  %v945_v52 = vmax.f32 %v928_v39, 0.0  ;;  %v1467_v10 = vmax.f32 %v1450_v24, 0.0  ;;  %v1513_v13 = vmul.f32 %v1494_v26, %v1465_v7 }
 0x290   :  { %v999_v8 = vadd.f32 %v998_v54, %v990_v23  ;;  %v992_v21 = vmul.f32 %v2802_v15, %v944_v55  ;;  %v1521_v63 = vadd.f32 %v1520_v30, %v1512_v11  ;;  %v1514_v40 = vmul.f32 %v1498_v60, %v1466_v0 }
 0x291   :  { %v1012_v22 = vadd.f32 %v1011_v45, %v991_v53  ;;  %v993_v38 = vmul.f32 %v2802_v15, %v945_v52  ;;  %v1534_v12 = vadd.f32 %v1533_v3, %v1513_v13  ;;  %v1515_v50 = vmul.f32 %v1498_v60, %v1467_v10 }
 0x292   :  { %v3008_v2 = vadd.f32 %v999_v8, %v992_v21  ;;  %v3010_v18 = vadd.f32 %v1521_v63, %v1514_v40 }
 0x293   :  { %v3012_v4 = vadd.f32 %v1012_v22, %v993_v38  ;;  %v3014_v36 = vadd.f32 %v1534_v12, %v1515_v50 }
 0x2b1   :  { %v1152_v61 = vpop.f32.mrb[16].mxu1 }
 0x2b2   :  { %v1153_v26 = vadd.f32 %v1152_v61, %v2912_v62  ;;  %v1154_v54 = vpop.f32.mrb[17].mxu1 }
 0x2b3   :  { %v1155_v28 = vadd.f32 %v1154_v54, %v2912_v62  ;;  %v1156_v43 = vpop.f32.mrb[18].mxu1 }
 0x2b4   :  { %v1191_v30 = vmax.f32 %v1153_v26, 0.0  ;;  %v1157_v15 = vadd.f32 %v1156_v43, %v2814_v47  ;;  %v1158_v49 = vpop.f32.mrb[19].mxu1 }
 0x2b5   :  { %v1192_v42 = vmax.f32 %v1155_v28, 0.0  ;;  %v1159_v45 = vadd.f32 %v1158_v49, %v2814_v47 }
 0x2b6   :  { %v1193_v5 = vmax.f32 %v1157_v15, 0.0  ;;  %v1239_v3 = vmul.f32 %v2848_v17, %v1191_v30  ;;  %v1001_v15 = vrot.slane %v3008_v2, 4 }
 0x2b7   :  { %v1194_v34 = vmax.f32 %v1159_v45, 0.0  ;;  %v1240_v31 = vmul.f32 %v2848_v17, %v1192_v42 }
 0x2b8   :  { %v1241_v56 = vmul.f32 %v2846_v6, %v1193_v5 }
 0x2b9   :  { %v1242_v58 = vmul.f32 %v2846_v6, %v1194_v34  ;;  %v1162_v59 = vpop.f32.mrb[20].mxu1 }
 0x2ba   :  { %v1255_v62 = vadd.f32 %v1241_v56, %v1239_v3  ;;  %v1163_v44 = vadd.f32 %v1162_v59, %v2823_v37  ;;  %v1164_v32 = vpop.f32.mrb[21].mxu1  ;;  %v1523_v3 = vrot.slane %v3010_v18, 4 }
 0x2bb   :  { %v1268_v27 = vadd.f32 %v1242_v58, %v1240_v31  ;;  %v1165_v57 = vadd.f32 %v1164_v32, %v2823_v37  ;;  %v1166_v20 = vpop.f32.mrb[22].mxu1 }
 0x2bc   :  { %v1195_v47 = vmax.f32 %v1163_v44, 0.0  ;;  %v1167_v39 = vadd.f32 %v1166_v20, %v2916_v14  ;;  %v1168_v7 = vpop.f32.mrb[23].mxu1  ;;  %v1002_v44 = vadd.f32 %v1001_v15, %v3008_v2 }
 0x2bd   :  { %v1196_v24 = vmax.f32 %v1165_v57, 0.0  ;;  %v1169_v60 = vadd.f32 %v1168_v7, %v2916_v14  ;;  %v3131_v7 = vld [vmem:[#allocation6_spill] sm:$0xff] }
 0x2be   :  { %v1243_v17 = vmul.f32 %v2854_v48, %v1195_v47  ;;  %v1197_v23 = vmax.f32 %v1167_v39, 0.0  ;;  %v1524_v47 = vadd.f32 %v1523_v3, %v3010_v18  ;;  %v3133_v3 = vld [vmem:[#allocation14_spill] sm:$0xff] }
 0x2bf   :  { %v1244_v6 = vmul.f32 %v2854_v48, %v1196_v24  ;;  %v1198_v55 = vmax.f32 %v1169_v60, 0.0 }
 0x2c0   :  { %v1256_v0 = vadd.f32 %v1255_v62, %v1243_v17  ;;  %v1245_v11 = vmul.f32 %v2862_v16, %v1197_v23  ;;  %v1003_v23 = vrot.slane %v1002_v44, 2 }
 0x2c1   :  { %v1269_v53 = vadd.f32 %v1268_v27, %v1244_v6  ;;  %v1246_v37 = vmul.f32 %v2862_v16, %v1198_v55  ;;  %v1172_v52 = vpop.f32.mrb[24].mxu1 }
 0x2c2   :  { %v1257_v10 = vadd.f32 %v1256_v0, %v1245_v11  ;;  %v1173_v13 = vadd.f32 %v1172_v52, %v2834_v9  ;;  %v1174_v8 = vpop.f32.mrb[25].mxu1  ;;  %v1525_v0 = vrot.slane %v1524_v47, 2 }
 0x2c3   :  { %v1270_v21 = vadd.f32 %v1269_v53, %v1246_v37  ;;  %v1175_v14 = vadd.f32 %v1174_v8, %v2834_v9  ;;  %v1176_v63 = vpop.f32.mrb[26].mxu1 }
 0x2c4   :  { %v1199_v40 = vmax.f32 %v1173_v13, 0.0  ;;  %v1177_v22 = vadd.f32 %v1176_v63, %v2920_v51  ;;  %v1178_v48 = vpop.f32.mrb[27].mxu1 }
 0x2c5   :  { %v1200_v38 = vmax.f32 %v1175_v14, 0.0  ;;  %v1179_v12 = vadd.f32 %v1178_v48, %v2920_v51  ;;  %v1014_v51 = vrot.slane %v3012_v4, 4 }
 0x2c6   :  { %v1247_v50 = vmul.f32 %v2852_v35, %v1199_v40  ;;  %v1201_v61 = vmax.f32 %v1177_v22, 0.0 }
 0x2c7   :  { %v1248_v16 = vmul.f32 %v2852_v35, %v1200_v38  ;;  %v1202_v26 = vmax.f32 %v1179_v12, 0.0  ;;  %v1015_v57 = vadd.f32 %v1014_v51, %v3012_v4 }
 0x2c8   :  { %v1258_v54 = vadd.f32 %v1257_v10, %v1247_v50  ;;  %v1249_v28 = vmul.f32 %v2868_v41, %v1201_v61  ;;  %v1526_v10 = vadd.f32 %v1525_v0, %v1524_v47 }
 0x2c9   :  { %v1271_v43 = vadd.f32 %v1270_v21, %v1248_v16  ;;  %v1250_v9 = vmul.f32 %v2868_v41, %v1202_v26  ;;  %v1182_v30 = vpop.f32.mrb[28].mxu1  ;;  %v1536_v41 = vrot.slane %v3014_v36, 4  ;;  %v1016_v6 = vrot.slane %v1015_v57, 2 }
 0x2ca   :  { %v1259_v49 = vadd.f32 %v1258_v54, %v1249_v28  ;;  %v1183_v42 = vadd.f32 %v1182_v30, %v2840_v46  ;;  %v1184_v45 = vpop.f32.mrb[29].mxu1  ;;  %v1527_v22 = vrot.slane %v1526_v10, 1 }
 0x2cb   :  { %v1272_v5 = vadd.f32 %v1271_v43, %v1250_v9  ;;  %v1185_v34 = vadd.f32 %v1184_v45, %v2840_v46  ;;  %v1186_v35 = vpop.f32.mrb[30].mxu1  ;;  %v1537_v60 = vadd.f32 %v1536_v41, %v3014_v36  ;;  %v1017_v52 = vadd.f32 %v1016_v6, %v1015_v57  ;;  %v3137_v6 = vld [vmem:[#allocation16_spill] sm:$0xff] }
 0x2cc   :  { %v1203_v56 = vmax.f32 %v1183_v42, 0.0  ;;  %v1187_v31 = vadd.f32 %v1186_v35, %v2924_v19  ;;  %v1188_v58 = vpop.f32.mrb[31].mxu1  ;;  %v1528_v54 = vadd.f32 %v1527_v22, %v1526_v10  ;;  %v3132_v42 = vld [vmem:[#allocation8_spill] sm:$0xff] }
 0x2cd   :  { %v1204_v59 = vmax.f32 %v1185_v34, 0.0  ;;  %v1189_v62 = vadd.f32 %v1188_v58, %v2924_v19  ;;  %v1538_v4 = vrot.slane %v1537_v60, 2  ;;  %v1018_v63 = vrot.slane %v1017_v52, 1 }
 0x2ce   :  { %v1251_v32 = vmul.f32 %v2860_v1, %v1203_v56  ;;  %v1205_v27 = vmax.f32 %v1187_v31, 0.0 }
 0x2cf   :  { %v1252_v46 = vmul.f32 %v2860_v1, %v1204_v59  ;;  %v1206_v20 = vmax.f32 %v1189_v62, 0.0  ;;  %v1004_v1 = vadd.f32 %v1003_v23, %v1002_v44  ;;  %v1539_v8 = vadd.f32 %v1538_v4, %v1537_v60  ;;  %v3134_v44 = vld [vmem:[#allocation10_spill] sm:$0xff] }
 0x2d0   :  { %v1260_v39 = vadd.f32 %v1259_v49, %v1251_v32  ;;  %v1253_v24 = vmul.f32 %v3131_v7, %v1205_v27  ;;  %v1019_v16 = vadd.f32 %v1018_v63, %v1017_v52  ;;  %v3135_v27 = vld [vmem:[#allocation11_spill] sm:$0xff] }
 0x2d1   :  { %v1273_v17 = vadd.f32 %v1272_v5, %v1252_v46  ;;  %v1254_v19 = vmul.f32 %v3131_v7, %v1206_v20  ;;  %v1005_v36 = vrot.slane %v1004_v1, 1  ;;  %v1540_v38 = vrot.slane %v1539_v8, 1  ;;  %v3136_v7 = vld [vmem:[#allocation9_spill] sm:$0xff] }
 0x2d2   :  { %v1261_v2 = vadd.f32 %v1260_v39, %v1253_v24 }
 0x2d3   :  { %v1274_v55 = vadd.f32 %v1273_v17, %v1254_v19  ;;  %v1006_v50 = vadd.f32 %v1005_v36, %v1004_v1  ;;  %v1541_v43 = vadd.f32 %v1540_v38, %v1539_v8  ;;  %v1735_v38 = vpop.permute.xlu1 %1734 }
 0x2d4   :  { %v1262_v11 = vrot.slane %v1261_v2, 4 }
 0x2d5   :  { %v1275_v53 = vrot.slane %v1274_v55, 4 }
 0x2d6   :  { %v1263_v37 = vadd.f32 %v1262_v11, %v1261_v2 }
 0x2d7   :  { %v1276_v18 = vadd.f32 %v1275_v53, %v1274_v55  ;;  %v3138_v53 = vld [vmem:[#allocation13_spill] sm:$0xff] }
 0x2d8   :  { %v1264_v13 = vrot.slane %v1263_v37, 2 }
 0x2d9   :  { %v1277_v21 = vrot.slane %v1276_v18, 2 }
 0x2da   :  { %v1265_v14 = vadd.f32 %v1264_v13, %v1263_v37  ;;  %v3139_v13 = vld [vmem:[#allocation7_spill] sm:$0xff] }
 0x2db   :  { %v1278_v40 = vadd.f32 %v1277_v21, %v1276_v18 }
 0x2dc   :  { %v1266_v48 = vrot.slane %v1265_v14, 1 }
 0x2dd   :  { %v1279_v12 = vrot.slane %v1278_v40, 1 }
 0x2de   :  { %v1267_v61 = vadd.f32 %v1266_v48, %v1265_v14 }
 0x2df   :  { %v1280_v26 = vadd.f32 %v1279_v12, %v1278_v40  ;;  %v3140_v40 = vld [vmem:[#allocation12_spill] sm:$0xff] }
 0x2e0   :  { %v1281_v28 = vadd.f32 %v1267_v61, %v1006_v50 }
 0x2e1   :  { %v1282_v9 = vadd.f32 %v1280_v26, %v1019_v16  ;;  %v3141_v26 = vld [vmem:[#allocation15_spill] sm:$0xff] }
 0x2e2   :  { %v3056_v30 = vadd.f32 %v1528_v54, %v1281_v28 }
 0x2e3   :  { %v3058_v15 = vadd.f32 %v1541_v43, %v1282_v9 }
 0x2f1   :  { %v1658_v49 = vpop.f32.mrb[32].mxu1 }
 0x2f2   :  { %v1659_v45 = vadd.f32 %v1658_v49, %v3132_v42  ;;  %v1660_v51 = vpop.f32.mrb[33].mxu1 }
 0x2f3   :  { %v1661_v5 = vadd.f32 %v1660_v51, %v3132_v42  ;;  %v1662_v34 = vpop.f32.mrb[34].mxu1 }
 0x2f4   :  { %v1697_v35 = vmax.f32 %v1659_v45, 0.0  ;;  %v1663_v56 = vadd.f32 %v1662_v34, %v3133_v3  ;;  %v1664_v31 = vpop.f32.mrb[35].mxu1 }
 0x2f5   :  { %v1698_v58 = vmax.f32 %v1661_v5, 0.0  ;;  %v1665_v41 = vadd.f32 %v1664_v31, %v3133_v3 }
 0x2f6   :  { %v1699_v59 = vmax.f32 %v1663_v56, 0.0  ;;  %v1745_v32 = vmul.f32 %v3134_v44, %v1697_v35  ;;  %v1739_v35 = vpop.permute.xlu1 %1738 }
 0x2f7   :  { %v1700_v62 = vmax.f32 %v1665_v41, 0.0  ;;  %v1746_v46 = vmul.f32 %v3134_v44, %v1698_v58 }
 0x2f8   :  { %v1747_v57 = vmul.f32 %v3135_v27, %v1699_v59 }
 0x2f9   :  { %v1748_v20 = vmul.f32 %v3135_v27, %v1700_v62  ;;  %v1668_v47 = vpop.f32.mrb[36].mxu1 }
 0x2fa   :  { %v1761_v39 = vadd.f32 %v1747_v57, %v1745_v32  ;;  %v1669_v24 = vadd.f32 %v1668_v47, %v3136_v7  ;;  %v1670_v60 = vpop.f32.mrb[37].mxu1 }
 0x2fb   :  { %v1774_v17 = vadd.f32 %v1748_v20, %v1746_v46  ;;  %v1671_v19 = vadd.f32 %v1670_v60, %v3136_v7  ;;  %v1672_v23 = vpop.f32.mrb[38].mxu1  ;;  %v1743_v7 = vpop.permute.xlu1 %1742 }
 0x2fc   :  { %v1701_v2 = vmax.f32 %v1669_v24, 0.0  ;;  %v1673_v55 = vadd.f32 %v1672_v23, %v3137_v6  ;;  %v1674_v0 = vpop.f32.mrb[39].mxu1 }
 0x2fd   :  { %v1702_v11 = vmax.f32 %v1671_v19, 0.0  ;;  %v1675_v4 = vadd.f32 %v1674_v0, %v3137_v6 }
 0x2fe   :  { %v1749_v1 = vmul.f32 %v3138_v53, %v1701_v2  ;;  %v1703_v37 = vmax.f32 %v1673_v55, 0.0 }
 0x2ff   :  { %v1750_v52 = vmul.f32 %v3138_v53, %v1702_v11  ;;  %v1704_v18 = vmax.f32 %v1675_v4, 0.0 }
 0x300   :  { %v1762_v10 = vadd.f32 %v1761_v39, %v1749_v1  ;;  %v1751_v8 = vmul.f32 %v3139_v13, %v1703_v37 }
 0x301   :  { %v1775_v21 = vadd.f32 %v1774_v17, %v1750_v52  ;;  %v1752_v36 = vmul.f32 %v3139_v13, %v1704_v18  ;;  %v1678_v14 = vpop.f32.mrb[40].mxu1 }
 0x302   :  { %v1763_v63 = vadd.f32 %v1762_v10, %v1751_v8  ;;  %v1679_v22 = vadd.f32 %v1678_v14, %v3140_v40  ;;  %v1680_v48 = vpop.f32.mrb[41].mxu1  ;;  %v1799_v10 = vlaneseq }
 0x303   :  { %v1776_v12 = vadd.f32 %v1775_v21, %v1752_v36  ;;  %v1681_v50 = vadd.f32 %v1680_v48, %v3140_v40  ;;  %v1682_v61 = vpop.f32.mrb[42].mxu1  ;;  %v1790_v36 = vstv %s3107_s4 }
 0x304   :  { %v1705_v16 = vmax.f32 %v1679_v22, 0.0  ;;  %v1683_v54 = vadd.f32 %v1682_v61, %v3141_v26  ;;  %v1684_v28 = vpop.f32.mrb[43].mxu1  ;;  %v1800_v40 = vshrl.u32 %v1799_v10, 7  ;;  %vm1813_vm1 = vcmp.lt.s32.totalorder %v1799_v10, 256 }
 0x305   :  { %v1706_v43 = vmax.f32 %v1681_v50, 0.0  ;;  %v1685_v9 = vadd.f32 %v1684_v28, %v3141_v26 }
 0x306   :  { %v1753_v49 = vmul.f32 %v2974_v29, %v1705_v16  ;;  %v1707_v42 = vmax.f32 %v1683_v54, 0.0 }
 0x307   :  { %v1754_v45 = vmul.f32 %v2974_v29, %v1706_v43  ;;  %v1708_v51 = vmax.f32 %v1685_v9, 0.0 }
 0x308   :  { %v1764_v5 = vadd.f32 %v1763_v63, %v1753_v49  ;;  %v1755_v34 = vmul.f32 %v1735_v38, %v1707_v42 }
 0x309   :  { %v1777_v3 = vadd.f32 %v1776_v12, %v1754_v45  ;;  %v1756_v56 = vmul.f32 %v1735_v38, %v1708_v51  ;;  %v1688_v31 = vpop.f32.mrb[44].mxu1 }
 0x30a   :  { %v1765_v58 = vadd.f32 %v1764_v5, %v1755_v34  ;;  %v1689_v41 = vadd.f32 %v1688_v31, %v2972_v33  ;;  %v1690_v59 = vpop.f32.mrb[45].mxu1 }
 0x30b   :  { %v1778_v62 = vadd.f32 %v1777_v3, %v1756_v56  ;;  %v1691_v44 = vadd.f32 %v1690_v59, %v2972_v33  ;;  %v1692_v32 = vpop.f32.mrb[46].mxu1 }
 0x30c   :  { %v1709_v27 = vmax.f32 %v1689_v41, 0.0  ;;  %v1693_v57 = vadd.f32 %v1692_v32, %v2990_v25  ;;  %v1694_v46 = vpop.f32.mrb[47].mxu1 }
 0x30d   :  { %v1710_v29 = vmax.f32 %v1691_v44, 0.0  ;;  %v1695_v20 = vadd.f32 %v1694_v46, %v2990_v25  ;;  %v2063_v25 = vmov 1966171168  }
 0x30e   :  { %v1757_v47 = vmul.f32 %v1739_v35, %v1709_v27  ;;  %v1711_v39 = vmax.f32 %v1693_v57, 0.0  ;;  %v1797_v18 = vunpack.c.l.s4 %v2063_v25 }
 0x30f   :  { %v1758_v24 = vmul.f32 %v1739_v35, %v1710_v29  ;;  %v1712_v60 = vmax.f32 %v1695_v20, 0.0 }
 0x310   :  { %v1766_v17 = vadd.f32 %v1765_v58, %v1757_v47  ;;  %v1759_v19 = vmul.f32 %v1743_v7, %v1711_v39  ;;  %v1798_v63 = vunpack.c.0.s8 %v1797_v18 }
 0x311   :  { %v1779_v23 = vadd.f32 %v1778_v62, %v1758_v24  ;;  %v1760_v2 = vmul.f32 %v1743_v7, %v1712_v60 }
 0x312   :  { %v1767_v6 = vadd.f32 %v1766_v17, %v1759_v19  ;;  %v1801_v50 = vsub.s32 %v1798_v63, %v1800_v40 }
 0x313   :  { %v1780_v55 = vadd.f32 %v1779_v23, %v1760_v2 }
 0x314   :  { %v1768_v33 = vrot.slane %v1767_v6, 4 }
 0x315   :  { %v1781_v0 = vrot.slane %v1780_v55, 4 }
 0x316   :  { %v1769_v11 = vadd.f32 %v1768_v33, %v1767_v6 }
 0x317   :  { %v1782_v4 = vadd.f32 %v1781_v0, %v1780_v55 }
 0x318   :  { %v1770_v53 = vrot.slane %v1769_v11, 2 }
 0x319   :  { %v1783_v1 = vrot.slane %v1782_v4, 2 }
 0x31a   :  { %v1771_v37 = vadd.f32 %v1770_v53, %v1769_v11 }
 0x31b   :  { %v1784_v52 = vadd.f32 %v1783_v1, %v1782_v4 }
 0x31c   :  { %v1772_v13 = vrot.slane %v1771_v37, 1 }
 0x31d   :  { %v1785_v8 = vrot.slane %v1784_v52, 1 }
 0x31e   :  { %v1773_v21 = vadd.f32 %v1772_v13, %v1771_v37 }
 0x31f   :  { %v1786_v14 = vadd.f32 %v1785_v8, %v1784_v52 }
 0x320   :  { %v1787_v22 = vadd.f32 %v1773_v21, %v3056_v30 }
 0x321   :  { %v1788_v48 = vadd.f32 %v1786_v14, %v3058_v15 }
 0x322   :  { %v1791_v38 = vadd.f32 %v1790_v36, %v1787_v22 }
 0x323   :  { %v1792_v12 = vadd.f32 %v1790_v36, %v1788_v48 }
 0x325   :  { %v1795_v61 = vcombine.low %v1791_v38, %v1792_v12 }
 0x327   :  { %v1802_v16 = vrot.slane %v1795_v61, %v1801_v50 }
 0x329   :  { %v1809_v26 = vrot.slane %v1802_v16, %v1801_v50 }
 0x32b   :  { %1815 = vst.msk [vmem:[#allocation3] sm:$0x3] %vm1813_vm1, %v1809_v26 }
 0x32c   :  { %1820 = vsyncadd [#allocation4], 16  ;;  %s2064_s16 = smov [#allocation3]  }
 0x32d   :  { %s1822_s17 = sshll.u32 %s2064_s16, 4  ;;  %s1823_s17 = int_to_ptr.vmem [resolvable:$true] %s1822_s17 }
 0x32e   :  { %s2036_s4 = scalar_lea.vmem %s1823_s17, 16  ;;  %s2040_s18 = scalar_lea.vmem %s1823_s17, 32 }
 0x32f   :  { %p2037_p0 = scmp.ne.s32.totalorder %s1823_s17, %s2036_s4  ;;  %p2041_p1 = scmp.lt.s32.totalorder %s1823_s17, %s1823_s17 }
 0x330   :  { %p2042_p2 = scmp.lt.s32.totalorder %s2040_s18, %s2036_s4 }
 0x332   :  { %p2043_p3 = por %p2042_p2, %p2041_p1 }
 0x334   :  { %p2044_p4 = pnand %p2043_p3, %p2037_p0 }
 0x336   :  { %2047 = shalt.err (!%p2044_p4)
}
 0x337   :  { %s2048_s20 = scalar_lea.hbm %s3108_s5, 16 }
 0x338   :  { %p2049_p5 = scmp.ne.s32.totalorder %s3108_s5, %s2048_s20  ;;  %p2052_p6 = scmp.lt.u32.totalorder %s2048_s20, %s3108_s5 }
 0x33a   :  { %p2054_p7 = pnand %p2052_p6, %p2049_p5 }
 0x33c   :  { %2057 = shalt.err (!%p2054_p7)
}
 0x33d   :  { %1825 = dma.vmem_to_hbm [thread:$0]  %s1823_s17, 16, %s3108_s5, [#allocation4]  }
 0x33e   :  { %2058 = dma.done.wait [#allocation4], 32  }
 0x33f   :  { %2059 = vsyncadd [#allocation4], 4294967264 }
 0x340   :  { %1829 = vsyncpa [#allocation4], 1 }

</bundles_post_ra>
